<compile_context>
chip_gen: v6e
topology: v6e:2x2x1
jax: 0.10.0
libtpu: 0.0.40
codegen_flags: <defaults>
</compile_context>

<pallas_src>
import math
import numpy as np
import jax
import jax.numpy as jnp
from jax.experimental import pallas as pl
from jax.experimental.pallas import tpu as pltpu

# ----------------------------- Barrett constants -----------------------------
AW = 0.001 * 25
A1 = 0.001 * 50
A2 = 0.001 * 70
DW = 0.001 * 76
DW_KNUCKLE = 0.001 * 42
PHI2 = 0.0
PHI3 = 0.0
R_COEF = (-1.0, 1.0, 0.0)
J_COEF = (1.0, 1.0, -1.0)

LANE = 128
SUBLANE = 8


def _pad_to(x, m):
    return ((x + m - 1) // m) * m


# ------------------------------- Pallas kernel -------------------------------
def _fused_xform_kernel(rows_ref, v_ref, o_ref):
    """Single-step fused vertex transform.

    rows_ref : VMEM (rows_pad, 8)    xyz rows of all 4x4 transforms (cols 4..7 zero)
    v_ref    : VMEM (8, L_total)     all meshes packed along lanes, homogeneous
                                     coords in sublanes 0..3 (4..7 zero)
    o_ref    : VMEM (rows_pad, L_total) transformed coordinates (lane dense)
    """
    o_ref[...] = jnp.dot(
        rows_ref[...], v_ref[...],
        precision=jax.lax.Precision.HIGHEST,
        preferred_element_type=jnp.float32)


def pack_meshes(mesh_list):
    """Pack homogeneous meshes [(Ni, 4) f32] into one lane-dense (8, L_total) slab.

    Returns (packed_verts, [(lane_offset, Ni), ...]). Padding lanes are zero, so
    transformed padding lanes are exactly zero and are sliced off afterwards.
    """
    segs, info = [], []
    off = 0
    for v in mesh_list:
        n = int(v.shape[0])
        n_pad = _pad_to(max(n, 1), LANE)
        seg = jnp.zeros((8, n_pad), jnp.float32).at[:4, :n].set(
            v.astype(jnp.float32).T)
        segs.append(seg)
        info.append((off, n))
        off += n_pad
    return jnp.concatenate(segs, axis=1), info


def fused_transform(mats_all, packed_verts):
    """mats_all: (B, T, 4, 4) f32, packed_verts: (8, L_total) f32
    -> (B, T, 3, L_total) lane-dense transformed xyz (one pallas_call, one step)."""
    B, T = mats_all.shape[0], mats_all.shape[1]
    n_rows = B * T * 3
    rows_pad = _pad_to(n_rows, SUBLANE)
    L_total = packed_verts.shape[1]

    rows = mats_all[:, :, :3, :].reshape(n_rows, 4).astype(jnp.float32)
    rows8 = jnp.zeros((rows_pad, 8), jnp.float32).at[:n_rows, :4].set(rows)

    out = pl.pallas_call(
        _fused_xform_kernel,
        out_shape=jax.ShapeDtypeStruct((rows_pad, L_total), jnp.float32),
        grid=(1,),
        in_specs=[
            pl.BlockSpec((rows_pad, 8), lambda i: (0, 0)),
            pl.BlockSpec((8, L_total), lambda i: (0, 0)),
        ],
        out_specs=pl.BlockSpec((rows_pad, L_total), lambda i: (0, 0)),
        compiler_params=pltpu.CompilerParams(
            dimension_semantics=("arbitrary",)),
    )(rows8, packed_verts)
    return out[:n_rows].reshape(B, T, 3, L_total)


# ---------------------------- plain-JAX glue code -----------------------------
def forward_kinematics(A, alpha, D, theta):
    """Denavit-Hartenberg transform. theta: (B,) -> (B, 4, 4) float32."""
    theta = theta.astype(jnp.float32)
    ct, st = jnp.cos(theta), jnp.sin(theta)
    ca = jnp.cos(jnp.float32(alpha))
    sa = jnp.sin(jnp.float32(alpha))
    o = jnp.ones_like(ct)
    z = jnp.zeros_like(ct)
    row0 = jnp.stack([ct, -st, z, A * o], axis=-1)
    row1 = jnp.stack([st * ca, ct * ca, -sa * o, -sa * D * o], axis=-1)
    row2 = jnp.stack([st * sa, ct * sa, ca * o, ca * D * o], axis=-1)
    row3 = jnp.stack([z, z, z, o], axis=-1)
    return jnp.stack([row0, row1, row2, row3], axis=-2)


def barrett_forward(pose, theta, palm, knuckle, finger, finger_tip):
    """Mirrors BarrettLayer.forward (PyTorch).

    pose : (B, 4, 4), theta : (B, 7)
    returns (palm_vertices (B,Np,3), all_knuckle_vertices (B,2,Nk,3),
             all_finger_vertices (B,3,Nf,3), all_finger_tip_vertices (B,3,Nt,3),
             joints (B,6,4,4))
    """
    pose = pose.astype(jnp.float32)
    theta = theta.astype(jnp.float32)

    rot_z_90 = jnp.eye(4, dtype=jnp.float32)
    rot_z_90 = rot_z_90.at[1, 1].set(-1.0).at[2, 3].set(-0.001 * 79)
    pose = jnp.matmul(pose, rot_z_90)

    knuckle_mats, finger_mats, tip_mats = [], [], []
    for i in range(3):
        Tw1 = forward_kinematics(
            R_COEF[i] * AW, 0.0, DW,
            R_COEF[i] * theta[:, 0] - math.pi / 2 * J_COEF[i])
        T12 = forward_kinematics(A1, math.pi / 2, 0.0, PHI2 + theta[:, i + 1])
        T23 = forward_kinematics(A2, math.pi, 0.0, PHI3 - theta[:, i + 4])
        if i in (0, 1):
            Twk = forward_kinematics(
                R_COEF[(i + 1) % 2] * AW, 0.0, DW_KNUCKLE,
                -1.0 * (R_COEF[i] * theta[:, 0] - math.pi / 2 * J_COEF[i]))
            knuckle_mats.append(jnp.matmul(pose, Twk))
        pose_to_T12 = jnp.matmul(jnp.matmul(pose, Tw1), T12)
        pose_to_T23 = jnp.matmul(pose_to_T12, T23)
        finger_mats.append(pose_to_T12)
        tip_mats.append(pose_to_T23)

    # All 9 transforms per batch element in a fixed order:
    #   [pose, knuckle0, knuckle1, T12_f0, T12_f1, T12_f2, T23_f0, T23_f1, T23_f2]
    mats_all = jnp.concatenate(
        [pose[:, None],
         jnp.stack(knuckle_mats, axis=1),
         jnp.stack(finger_mats, axis=1),
         jnp.stack(tip_mats, axis=1)], axis=1)                 # (B, 9, 4, 4)

    packed_verts, seg_info = pack_meshes([palm, knuckle, finger, finger_tip])
    out = fused_transform(mats_all, packed_verts)              # (B, 9, 3, L_total)

    (p_off, p_n), (k_off, k_n), (f_off, f_n), (t_off, t_n) = seg_info
    palm_vertices = jnp.transpose(
        out[:, 0, :, p_off:p_off + p_n], (0, 2, 1))                    # (B, Np, 3)
    all_knuckle_vertices = jnp.transpose(
        out[:, 1:3, :, k_off:k_off + k_n], (0, 1, 3, 2))               # (B, 2, Nk, 3)
    all_finger_vertices = jnp.transpose(
        out[:, 3:6, :, f_off:f_off + f_n], (0, 1, 3, 2))               # (B, 3, Nf, 3)
    all_finger_tip_vertices = jnp.transpose(
        out[:, 6:9, :, t_off:t_off + t_n], (0, 1, 3, 2))               # (B, 3, Nt, 3)

    joints = jnp.stack([finger_mats[0], tip_mats[0],
                        finger_mats[1], tip_mats[1],
                        finger_mats[2], tip_mats[2]], axis=1)  # (B, 6, 4, 4)
    return (palm_vertices, all_knuckle_vertices, all_finger_vertices,
            all_finger_tip_vertices, joints)


def _ref_transform(mats, verts):
    return jnp.einsum("btij,nj->btni", mats, verts)[..., :3]


if __name__ == "__main__":
    key = jax.random.PRNGKey(0)
    k_pose, k_theta, k_palm, k_knu, k_fin, k_tip = jax.random.split(key, 6)

    B = 2
    # pose: homogeneous transform per batch (random 3x4 top block, [0,0,0,1] row)
    top = jax.random.normal(k_pose, (B, 3, 4), dtype=jnp.float32) * 0.1
    bottom = jnp.tile(jnp.array([[[0.0, 0.0, 0.0, 1.0]]], jnp.float32), (B, 1, 1))
    pose = jnp.concatenate([top, bottom], axis=1)                       # (2, 4, 4)
    theta = jax.random.uniform(k_theta, (B, 7), jnp.float32, 0.0, 1.0)  # (2, 7)

    # Synthetic deterministic meshes (homogeneous vertices, w = 1).
    def make_mesh(k, n):
        xyz = jax.random.normal(k, (n, 3), dtype=jnp.float32) * 0.05
        return jnp.concatenate([xyz, jnp.ones((n, 1), jnp.float32)], axis=1)

    palm = make_mesh(k_palm, 280)
    knuckle = make_mesh(k_knu, 100)
    finger = make_mesh(k_fin, 150)
    finger_tip = make_mesh(k_tip, 120)

    fwd = jax.jit(barrett_forward)
    outs = fwd(pose, theta, palm, knuckle, finger, finger_tip)
    outs = jax.block_until_ready(outs)
    palm_v, knuckle_v, finger_v, tip_v, joints = outs

    assert palm_v.shape == (B, 280, 3)
    assert knuckle_v.shape == (B, 2, 100, 3)
    assert finger_v.shape == (B, 3, 150, 3)
    assert tip_v.shape == (B, 3, 120, 3)
    assert joints.shape == (B, 6, 4, 4)

    # correctness check of the Pallas vertex-transform against pure-JAX einsum
    rot = jnp.eye(4, dtype=jnp.float32).at[1, 1].set(-1.0).at[2, 3].set(-0.001 * 79)
    pose_r = jnp.matmul(pose, rot)

    ref_palm = _ref_transform(pose_r[:, None], palm)[:, 0]
    np.testing.assert_allclose(np.asarray(palm_v), np.asarray(ref_palm),
                               rtol=1e-5, atol=1e-5)

    knu_mats = []
    for i in range(2):
        Twk = forward_kinematics(
            R_COEF[(i + 1) % 2] * AW, 0.0, DW_KNUCKLE,
            -1.0 * (R_COEF[i] * theta[:, 0] - math.pi / 2 * J_COEF[i]))
        knu_mats.append(jnp.matmul(pose_r, Twk))
    ref_knu = _ref_transform(jnp.stack(knu_mats, axis=1), knuckle)
    np.testing.assert_allclose(np.asarray(knuckle_v), np.asarray(ref_knu),
                               rtol=1e-5, atol=1e-5)

    ref_fin = _ref_transform(joints[:, 0::2], finger)
    np.testing.assert_allclose(np.asarray(finger_v), np.asarray(ref_fin),
                               rtol=1e-5, atol=1e-5)
    ref_tip = _ref_transform(joints[:, 1::2], finger_tip)
    np.testing.assert_allclose(np.asarray(tip_v), np.asarray(ref_tip),
                               rtol=1e-5, atol=1e-5)

    print("KERNEL_OK")
</pallas_src>

<mosaic_0001>
module attributes {stable_mosaic.version = 11 : i64} {
  func.func @_fused_xform_kernel(%arg0: i32, %arg1: memref<56x8xf32, #tpu.memory_space<vmem>>, %arg2: memref<8x896xf32, #tpu.memory_space<vmem>>, %arg3: memref<56x896xf32, #tpu.memory_space<vmem>>) attributes {dimension_semantics = [#tpu.dimension_semantics<arbitrary>], iteration_bounds = array<i64: 1>, scalar_prefetch = 0 : i64, scratch_operands = 0 : i64, tpu.core_type = #tpu.core_type<tc>, window_params = [{pipeline_mode = #tpu.pipeline_mode<synchronous>, transform_indices = @transform_0, window_bounds = array<i64: 56, 8>}, {pipeline_mode = #tpu.pipeline_mode<synchronous>, transform_indices = @transform_1, window_bounds = array<i64: 8, 896>}, {pipeline_mode = #tpu.pipeline_mode<synchronous>, transform_indices = @transform_2, window_bounds = array<i64: 56, 896>}]} {
    %c0 = arith.constant 0 : index
    %c0_0 = arith.constant 0 : index
    %0 = vector.load %arg1[%c0, %c0_0] : memref<56x8xf32, #tpu.memory_space<vmem>>, vector<56x8xf32>
    %c0_1 = arith.constant 0 : index
    %c0_2 = arith.constant 0 : index
    %1 = vector.load %arg2[%c0_1, %c0_2] : memref<8x896xf32, #tpu.memory_space<vmem>>, vector<8x896xf32>
    %cst = arith.constant dense<0.000000e+00> : vector<56x896xf32>
    %2 = tpu.matmul %0, %1, %cst {dimension_numbers = #tpu.dot_dimension_numbers<[1], [0], [0], [1], [0, 0, 1, 1], [], []>, precision = #tpu.contract_precision<fp32>} : vector<56x8xf32>, vector<8x896xf32>, vector<56x896xf32> -> vector<56x896xf32>
    %c0_3 = arith.constant 0 : index
    %c0_4 = arith.constant 0 : index
    %3 = vector.load %arg3[%c0_3, %c0_4] : memref<56x896xf32, #tpu.memory_space<vmem>>, vector<56x896xf32>
    tpu.vector_store %arg3[%c0_3, %c0_4], %2 {strides = array<i32>} : memref<56x896xf32, #tpu.memory_space<vmem>>, vector<56x896xf32>,
    return
  }
  func.func @transform_0(%arg0: i32) -> (i32, i32) {
    %c0_i32 = arith.constant 0 : i32
    %c0_i32_0 = arith.constant 0 : i32
    %c0_i32_1 = arith.constant 0 : i32
    return %c0_i32, %c0_i32_0 : i32, i32
  }
  func.func @transform_1(%arg0: i32) -> (i32, i32) {
    %c0_i32 = arith.constant 0 : i32
    %c0_i32_0 = arith.constant 0 : i32
    %c0_i32_1 = arith.constant 0 : i32
    return %c0_i32, %c0_i32_0 : i32, i32
  }
  func.func @transform_2(%arg0: i32) -> (i32, i32) {
    %c0_i32 = arith.constant 0 : i32
    %c0_i32_0 = arith.constant 0 : i32
    %c0_i32_1 = arith.constant 0 : i32
    return %c0_i32, %c0_i32_0 : i32, i32
  }
}

</mosaic_0001>

<bundles_post_ra>
// kernel: barrett_forward.1
= control target key start
LH: loop header
LB: loop body
LE: loop exit
PB: predicated region body
PF: predicated region fallthrough
CT: control target
= control target key end

     0   :  { %vm25_vm0 = vcmask 64512   ;;  %v3269_v2 = vmov 0.0   ;;  %vm3270_vm1 = vmmov 0   ;;  %s4445_s1 = inlined_call_operand.vmem [shape: f32[8,896], index: 1, kind: input, shape index: {}]   ;;  %s4446_s0 = inlined_call_operand.vmem [shape: f32[56,8], index: 0, kind: input, shape index: {}]   ;;  %s4447_s2 = inlined_call_operand.vmem [shape: f32[56,896], index: 2, kind: output, shape index: {}]  }
   0x1   :  { %v19_v0 = vld [vmem:[%s4445_s1 + $0x8] sm:$0xff]  ;;  %v18_v1 = vld [vmem:[%s4445_s1] sm:$0xff]  ;;  %113 = vmatprep.mubr.f32.mxu0 %v3269_v2  ;;  %265 = vmatprep.mubr.f32.mxu1 %v3269_v2  ;;  %v13_v8 = vld [vmem:[%s4446_s0 + $0x10] sm:$0xff] }
   0x2   :  { %v11_v3 = vld [vmem:[%s4446_s0] sm:$0xff]  ;;  %v3297_v4 = vand.u32 4294901760, %v19_v0  ;;  %v3299_v5 = vand.u32 4294901760, %v18_v1  ;;  %v12_v7 = vld [vmem:[%s4446_s0 + $0x8] sm:$0xff]  ;;  %v14_v9 = vld [vmem:[%s4446_s0 + $0x18] sm:$0xff]  ;;  %v33_v12 = vsel %vm25_vm0, %v13_v8, 0 }
   0x3   :  { %v27_v6 = vsel %vm25_vm0, %v11_v3, 0  ;;  %v30_v11 = vsel %vm25_vm0, %v12_v7, 0  ;;  %v36_v13 = vsel %vm25_vm0, %v14_v9, 0  ;;  %v15_v14 = vld [vmem:[%s4446_s0 + $0x20] sm:$0xff]  ;;  %v3326_v18 = vand.u32 4294901760, %v33_v12  ;;  %v16_v22 = vld [vmem:[%s4446_s0 + $0x28] sm:$0xff] }
   0x4   :  { %v3311_v10 = vand.u32 4294901760, %v27_v6  ;;  %78 = vmatprep.subr.mxu0 %v3297_v4  ;;  %v222_v15 = vsub.f32 %v19_v0, %v3297_v4  ;;  %v3322_v16 = vsub.f32 %v18_v1, %v3299_v5  ;;  %v3324_v17 = vand.u32 4294901760, %v30_v11  ;;  %v17_v40 = vld [vmem:[%s4446_s0 + $0x30] sm:$0xff]  ;;  %v21_v56 = vld [vmem:[%s4445_s1 + $0x18] sm:$0xff] }
   0x5   :  { %80 = vmatpush1.msra.mxu0 %v3299_v5  ;;  %v3332_v20 = vand.u32 4294901760, %v36_v13  ;;  %v39_v21 = vsel %vm25_vm0, %v15_v14, 0  ;;  %v3343_v26 = vsub.f32 %v33_v12, %v3326_v18  ;;  %v42_v31 = vsel %vm25_vm0, %v16_v22, 0  ;;  %v23_v12 = vld [vmem:[%s4445_s1 + $0x28] sm:$0xff]  ;;  %v22_v22 = vld [vmem:[%s4445_s1 + $0x20] sm:$0xff] }
   0x6   :  { %v3330_v19 = vsub.f32 %v27_v6, %v3311_v10  ;;  %v223_v23 = vand.u32 4294901760, %v222_v15  ;;  %347 = vmatprep.subr.mxu0 %v222_v15  ;;  %v229_v24 = vand.u32 4294901760, %v3322_v16  ;;  %v3340_v25 = vsub.f32 %v30_v11, %v3324_v17  ;;  %v20_v6 = vld [vmem:[%s4445_s1 + $0x10] sm:$0xff] }
   0x7   :  { %4474 = vst [vmem:[#allocation3_spill] sm:$0xff] %v3332_v20  ;;  %4476 = vst [vmem:[#allocation5_spill] sm:$0xff] %v3343_v26  ;;  %v3358_v33 = vand.u32 4294901760, %v3343_v26  ;;  %v3361_v34 = vsub.f32 %v36_v13, %v3332_v20  ;;  %v3363_v35 = vand.u32 4294901760, %v39_v21  ;;  %v3372_v41 = vand.u32 4294901760, %v42_v31 }
   0x8   :  { %4473 = vst [vmem:[#allocation2_spill] sm:$0xff] %v3330_v19  ;;  %4475 = vst [vmem:[#allocation4_spill] sm:$0xff] %v3340_v25  ;;  %v3346_v27 = vand.u32 4294901760, %v3330_v19  ;;  %v224_v28 = vsub.f32 %v222_v15, %v223_v23  ;;  %v230_v29 = vsub.f32 %v3322_v16, %v229_v24  ;;  %v3352_v30 = vand.u32 4294901760, %v3340_v25 }
   0x9   :  { %4479 = vst [vmem:[#allocation8_spill] sm:$0xff] %v3358_v33  ;;  %4480 = vst [vmem:[#allocation9_spill] sm:$0xff] %v3361_v34  ;;  %v139_v43 = vsub.f32 %v3343_v26, %v3358_v33  ;;  %v3380_v44 = vand.u32 4294901760, %v3361_v34  ;;  %v3383_v45 = vsub.f32 %v39_v21, %v3363_v35  ;;  %v45_v46 = vsel %vm25_vm0, %v17_v40, 0 }
   0xa   :  { %4477 = vst [vmem:[#allocation6_spill] sm:$0xff] %v3346_v27  ;;  %4478 = vst [vmem:[#allocation7_spill] sm:$0xff] %v3352_v30  ;;  %v117_v32 = vsub.f32 %v3330_v19, %v3346_v27  ;;  %v225_v36 = vand.u32 4294901760, %v224_v28  ;;  %v231_v37 = vand.u32 4294901760, %v230_v29  ;;  %v128_v38 = vsub.f32 %v3340_v25, %v3352_v30 }
   0xb   :  { %4481 = vst [vmem:[#allocation10_spill] sm:$0xff] %v3363_v35  ;;  %4482 = vst [vmem:[#allocation11_spill] sm:$0xff] %v3372_v41  ;;  %v3393_v47 = vsub.f32 %v42_v31, %v3372_v41  ;;  %v3396_v48 = vand.u32 4294901760, %v139_v43  ;;  %v150_v49 = vsub.f32 %v3361_v34, %v3380_v44  ;;  %v3401_v50 = vand.u32 4294901760, %v3383_v45 }
   0xc   :  { %v3367_v39 = vand.u32 4294901760, %v117_v32  ;;  %226 = vmatprep.subr.mxu1 %v225_v36  ;;  %v3375_v42 = vand.u32 4294901760, %v128_v38  ;;  %4483 = vst [vmem:[#allocation12_spill] sm:$0xff] %v3380_v44  ;;  %4484 = vst [vmem:[#allocation13_spill] sm:$0xff] %v3383_v45  ;;  %v3403_v51 = vand.u32 4294901760, %v45_v46  ;;  %v3434_v60 = vand.u32 4294901760, %v21_v56 }
   0xd   :  { %232 = vmatpush1.msra.mxu1 %v231_v37  ;;  %4485 = vst [vmem:[#allocation14_spill] sm:$0xff] %v3393_v47  ;;  %4486 = vst [vmem:[#allocation15_spill] sm:$0xff] %v3401_v50  ;;  %v3410_v52 = vand.u32 4294901760, %v150_v49  ;;  %v161_v53 = vsub.f32 %v3383_v45, %v3401_v50  ;;  %v3415_v54 = vand.u32 4294901760, %v3393_v47  ;;  %v3560_v13 = vand.u32 4294901760, %v23_v12 }
   0xe   :  { %119 = vmatmul.mubr.f32.vlgmr.msra.gmra.mxu0 %v3367_v39  ;;  %267 = vmatmul.mubr.f32.vlgmr.msra.gmra.mxu1 %v3311_v10  ;;  %v3418_v55 = vsub.f32 %v45_v46, %v3403_v51  ;;  %v3445_v63 = vsub.f32 %v21_v56, %v3434_v60 }
   0xf   :  { %350 = vmatpush1.msra.mxu0 %v3322_v16  ;;  %471 = vmatprep.subr.mxu1 %v3297_v4  ;;  %4487 = vst [vmem:[#allocation16_spill] sm:$0xff] %v3410_v52  ;;  %4488 = vst [vmem:[#allocation17_spill] sm:$0xff] %v3415_v54  ;;  %v3427_v57 = vand.u32 4294901760, %v161_v53  ;;  %v172_v58 = vsub.f32 %v3393_v47, %v3415_v54  ;;  %v3567_v14 = vsub.f32 %v23_v12, %v3560_v13 }
  0x10   :  { %124 = vmatprep.mubr.f32.mxu0 %v3269_v2  ;;  %473 = vmatpush1.msra.mxu1 %v3299_v5  ;;  %4489 = vst [vmem:[#allocation18_spill] sm:$0xff] %v3418_v55  ;;  %v3432_v59 = vand.u32 4294901760, %v3418_v55  ;;  %v982_v1 = vand.u32 4294901760, %v3445_v63 }
  0x11   :  { %272 = vmatprep.mubr.f32.mxu1 %v3269_v2  ;;  %603 = vmatprep.subr.mxu0 %v223_v23  ;;  %4490 = vst [vmem:[#allocation19_spill] sm:$0xff] %v3427_v57  ;;  %v3440_v61 = vand.u32 4294901760, %v172_v58  ;;  %v1741_v15 = vand.u32 4294901760, %v3567_v14  ;;  %v3603_v23 = vand.u32 4294901760, %v22_v22 }
  0x12   :  { %130 = vmatmul.mubr.f32.gmra.mxu0 %v3375_v42  ;;  %274 = vmatmul.mubr.f32.gmra.mxu1 %v3324_v17  ;;  %4491 = vst [vmem:[#allocation20_spill] sm:$0xff] %v3432_v59  ;;  %v183_v62 = vsub.f32 %v3418_v55, %v3432_v59  ;;  %v983_v3 = vsub.f32 %v3445_v63, %v982_v1 }
  0x13   :  { %135 = vmatprep.mubr.f32.mxu0 %v3269_v2  ;;  %279 = vmatprep.mubr.f32.mxu1 %v3269_v2  ;;  %4492 = vst [vmem:[#allocation21_spill] sm:$0xff] %v3440_v61  ;;  %v1742_v16 = vsub.f32 %v3567_v14, %v1741_v15 }
  0x14   :  { %721 = vmatprep.subr.mxu1 %v3297_v4  ;;  %v3451_v0 = vand.u32 4294901760, %v183_v62  ;;  %v984_v4 = vand.u32 4294901760, %v983_v3  ;;  %v24_v62 = vld [vmem:[%s4445_s1 + $0x30] sm:$0xff] }
  0x15   :  { %v1743_v21 = vand.u32 4294901760, %v1742_v16 }
  0x16   :  { %141 = vmatmul.mubr.f32.gmra.mxu0 %v3396_v48  ;;  %281 = vmatmul.mubr.f32.gmra.mxu1 %v3326_v18  ;;  %4493 = vst [vmem:[#allocation22_spill] sm:$0xff] %v3451_v0 }
  0x17   :  { %146 = vmatprep.mubr.f32.mxu0 %v3269_v2  ;;  %286 = vmatprep.mubr.f32.mxu1 %v3269_v2 }
  0x1a   :  { %152 = vmatmul.mubr.f32.gmra.mxu0 %v3410_v52  ;;  %288 = vmatmul.mubr.f32.gmra.mxu1 %v3332_v20 }
  0x1b   :  { %157 = vmatprep.mubr.f32.mxu0 %v3269_v2  ;;  %293 = vmatprep.mubr.f32.mxu1 %v3269_v2 }
  0x1e   :  { %163 = vmatmul.mubr.f32.gmra.mxu0 %v3427_v57  ;;  %295 = vmatmul.mubr.f32.gmra.mxu1 %v3363_v35 }
  0x1f   :  { %168 = vmatprep.mubr.f32.mxu0 %v3269_v2  ;;  %300 = vmatprep.mubr.f32.mxu1 %v3269_v2 }
  0x22   :  { %174 = vmatmul.mubr.f32.gmra.mxu0 %v3440_v61  ;;  %302 = vmatmul.mubr.f32.gmra.mxu1 %v3372_v41 }
  0x23   :  { %179 = vmatprep.mubr.f32.mxu0 %v3269_v2  ;;  %307 = vmatprep.mubr.f32.mxu1 %v3269_v2 }
  0x26   :  { %185 = vmatmul.mubr.f32.gmra.mxu0 %v3451_v0  ;;  %309 = vmatmul.mubr.f32.gmra.mxu1 %v3403_v51 }
  0x27   :  { %383 = vmatprep.mubr.f32.mxu0 %v3269_v2  ;;  %506 = vmatprep.mubr.f32.mxu1 %v3269_v2 }
  0x2a   :  { %386 = vmatmul.mubr.f32.vlgmr.msra.gmra.mxu0 %v3330_v19  ;;  %510 = vmatmul.mubr.f32.vlgmr.msra.gmra.mxu1 %v3346_v27 }
  0x2b   :  { %607 = vmatpush1.msra.mxu0 %v229_v24  ;;  %723 = vmatpush1.msra.mxu1 %v3299_v5  ;;  %v3483_v5 = vand.u32 4294901760, %v20_v6  ;;  %v3610_v24 = vsub.f32 %v22_v22, %v3603_v23 }
  0x2c   :  { %391 = vmatprep.mubr.f32.mxu0 %v3269_v2  ;;  %515 = vmatprep.mubr.f32.mxu1 %v3269_v2 }
  0x2d   :  { %837 = vmatprep.subr.mxu0 %v3434_v60  ;;  %985 = vmatprep.subr.mxu1 %v984_v4  ;;  %v3490_v7 = vsub.f32 %v20_v6, %v3483_v5  ;;  %v1747_v28 = vand.u32 4294901760, %v3610_v24  ;;  %v3742_v4 = vand.u32 4294901760, %v24_v62 }
  0x2e   :  { %394 = vmatmul.mubr.f32.gmra.mxu0 %v3340_v25  ;;  %519 = vmatmul.mubr.f32.gmra.mxu1 %v3352_v30 }
  0x2f   :  { %399 = vmatprep.mubr.f32.mxu0 %v3269_v2  ;;  %524 = vmatprep.mubr.f32.mxu1 %v3269_v2  ;;  %v988_v8 = vand.u32 4294901760, %v3490_v7  ;;  %v1748_v29 = vsub.f32 %v3610_v24, %v1747_v28 }
  0x31   :  { %v989_v9 = vsub.f32 %v3490_v7, %v988_v8  ;;  %v1749_v31 = vand.u32 4294901760, %v1748_v29 }
  0x32   :  { %402 = vmatmul.mubr.f32.gmra.mxu0 %v3343_v26  ;;  %528 = vmatmul.mubr.f32.gmra.mxu1 %v3358_v33 }
  0x33   :  { %407 = vmatprep.mubr.f32.mxu0 %v3269_v2  ;;  %533 = vmatprep.mubr.f32.mxu1 %v3269_v2  ;;  %v990_v11 = vand.u32 4294901760, %v989_v9  ;;  %v3757_v9 = vsub.f32 %v24_v62, %v3742_v4 }
  0x36   :  { %410 = vmatmul.mubr.f32.gmra.mxu0 %v3361_v34  ;;  %537 = vmatmul.mubr.f32.gmra.mxu1 %v3380_v44 }
  0x37   :  { %415 = vmatprep.mubr.f32.mxu0 %v3269_v2  ;;  %542 = vmatprep.mubr.f32.mxu1 %v3269_v2 }
  0x3a   :  { %418 = vmatmul.mubr.f32.gmra.mxu0 %v3383_v45  ;;  %546 = vmatmul.mubr.f32.gmra.mxu1 %v3401_v50 }
  0x3b   :  { %423 = vmatprep.mubr.f32.mxu0 %v3269_v2  ;;  %551 = vmatprep.mubr.f32.mxu1 %v3269_v2 }
  0x3e   :  { %426 = vmatmul.mubr.f32.gmra.mxu0 %v3393_v47  ;;  %555 = vmatmul.mubr.f32.gmra.mxu1 %v3415_v54 }
  0x3f   :  { %431 = vmatprep.mubr.f32.mxu0 %v3269_v2  ;;  %560 = vmatprep.mubr.f32.mxu1 %v3269_v2 }
  0x42   :  { %434 = vmatmul.mubr.f32.gmra.mxu0 %v3418_v55  ;;  %564 = vmatmul.mubr.f32.gmra.mxu1 %v3432_v59 }
  0x43   :  { %640 = vmatprep.mubr.f32.mxu0 %v3269_v2  ;;  %756 = vmatprep.mubr.f32.mxu1 %v3269_v2 }
  0x46   :  { %642 = vmatmul.mubr.f32.vlgmr.msra.gmra.mxu0 %v3311_v10  ;;  %758 = vmatmul.mubr.f32.vlgmr.msra.gmra.mxu1 %v3311_v10 }
  0x47   :  { %839 = vmatpush1.msra.mxu0 %v3483_v5  ;;  %991 = vmatpush1.msra.mxu1 %v990_v11 }
  0x48   :  { %647 = vmatprep.mubr.f32.mxu0 %v3269_v2  ;;  %763 = vmatprep.mubr.f32.mxu1 %v3269_v2 }
  0x49   :  { %1106 = vmatprep.subr.mxu0 %v3445_v63  ;;  %1230 = vmatprep.subr.mxu1 %v3434_v60 }
  0x4a   :  { %649 = vmatmul.mubr.f32.gmra.mxu0 %v3324_v17  ;;  %765 = vmatmul.mubr.f32.gmra.mxu1 %v3324_v17 }
  0x4b   :  { %654 = vmatprep.mubr.f32.mxu0 %v3269_v2  ;;  %770 = vmatprep.mubr.f32.mxu1 %v3269_v2 }
  0x4e   :  { %656 = vmatmul.mubr.f32.gmra.mxu0 %v3326_v18  ;;  %772 = vmatmul.mubr.f32.gmra.mxu1 %v3326_v18 }
  0x4f   :  { %661 = vmatprep.mubr.f32.mxu0 %v3269_v2  ;;  %777 = vmatprep.mubr.f32.mxu1 %v3269_v2 }
  0x52   :  { %663 = vmatmul.mubr.f32.gmra.mxu0 %v3332_v20  ;;  %779 = vmatmul.mubr.f32.gmra.mxu1 %v3332_v20 }
  0x53   :  { %668 = vmatprep.mubr.f32.mxu0 %v3269_v2  ;;  %784 = vmatprep.mubr.f32.mxu1 %v3269_v2 }
  0x56   :  { %670 = vmatmul.mubr.f32.gmra.mxu0 %v3363_v35  ;;  %786 = vmatmul.mubr.f32.gmra.mxu1 %v3363_v35 }
  0x57   :  { %675 = vmatprep.mubr.f32.mxu0 %v3269_v2  ;;  %791 = vmatprep.mubr.f32.mxu1 %v3269_v2 }
  0x5a   :  { %677 = vmatmul.mubr.f32.gmra.mxu0 %v3372_v41  ;;  %793 = vmatmul.mubr.f32.gmra.mxu1 %v3372_v41 }
  0x5b   :  { %682 = vmatprep.mubr.f32.mxu0 %v3269_v2  ;;  %798 = vmatprep.mubr.f32.mxu1 %v3269_v2 }
  0x5e   :  { %684 = vmatmul.mubr.f32.gmra.mxu0 %v3403_v51  ;;  %800 = vmatmul.mubr.f32.gmra.mxu1 %v3403_v51 }
  0x5f   :  { %872 = vmatprep.mubr.f32.mxu0 %v3269_v2  ;;  %1024 = vmatprep.mubr.f32.mxu1 %v3269_v2 }
  0x62   :  { %878 = vmatmul.mubr.f32.vlgmr.msra.gmra.mxu0 %v3367_v39  ;;  %1026 = vmatmul.mubr.f32.vlgmr.msra.gmra.mxu1 %v3311_v10 }
  0x63   :  { %1109 = vmatpush1.msra.mxu0 %v3490_v7  ;;  %1232 = vmatpush1.msra.mxu1 %v3483_v5 }
  0x64   :  { %883 = vmatprep.mubr.f32.mxu0 %v3269_v2  ;;  %1031 = vmatprep.mubr.f32.mxu1 %v3269_v2 }
  0x65   :  { %1362 = vmatprep.subr.mxu0 %v982_v1  ;;  %1480 = vmatprep.subr.mxu1 %v3434_v60 }
  0x66   :  { %889 = vmatmul.mubr.f32.gmra.mxu0 %v3375_v42  ;;  %1033 = vmatmul.mubr.f32.gmra.mxu1 %v3324_v17 }
  0x67   :  { %894 = vmatprep.mubr.f32.mxu0 %v3269_v2  ;;  %1038 = vmatprep.mubr.f32.mxu1 %v3269_v2 }
  0x6a   :  { %900 = vmatmul.mubr.f32.gmra.mxu0 %v3396_v48  ;;  %1040 = vmatmul.mubr.f32.gmra.mxu1 %v3326_v18 }
  0x6b   :  { %905 = vmatprep.mubr.f32.mxu0 %v3269_v2  ;;  %1045 = vmatprep.mubr.f32.mxu1 %v3269_v2 }
  0x6e   :  { %911 = vmatmul.mubr.f32.gmra.mxu0 %v3410_v52  ;;  %1047 = vmatmul.mubr.f32.gmra.mxu1 %v3332_v20 }
  0x6f   :  { %916 = vmatprep.mubr.f32.mxu0 %v3269_v2  ;;  %1052 = vmatprep.mubr.f32.mxu1 %v3269_v2 }
  0x72   :  { %922 = vmatmul.mubr.f32.gmra.mxu0 %v3427_v57  ;;  %1054 = vmatmul.mubr.f32.gmra.mxu1 %v3363_v35 }
  0x73   :  { %927 = vmatprep.mubr.f32.mxu0 %v3269_v2  ;;  %1059 = vmatprep.mubr.f32.mxu1 %v3269_v2 }
  0x76   :  { %933 = vmatmul.mubr.f32.gmra.mxu0 %v3440_v61  ;;  %1061 = vmatmul.mubr.f32.gmra.mxu1 %v3372_v41 }
  0x77   :  { %938 = vmatprep.mubr.f32.mxu0 %v3269_v2  ;;  %1066 = vmatprep.mubr.f32.mxu1 %v3269_v2 }
  0x7a   :  { %944 = vmatmul.mubr.f32.gmra.mxu0 %v3451_v0  ;;  %1068 = vmatmul.mubr.f32.gmra.mxu1 %v3403_v51 }
  0x7b   :  { %1142 = vmatprep.mubr.f32.mxu0 %v3269_v2  ;;  %1265 = vmatprep.mubr.f32.mxu1 %v3269_v2 }
  0x7e   :  { %1145 = vmatmul.mubr.f32.vlgmr.msra.gmra.mxu0 %v3330_v19  ;;  %1269 = vmatmul.mubr.f32.vlgmr.msra.gmra.mxu1 %v3346_v27 }
  0x7f   :  { %1366 = vmatpush1.msra.mxu0 %v988_v8  ;;  %1482 = vmatpush1.msra.mxu1 %v3483_v5 }
  0x80   :  { %1150 = vmatprep.mubr.f32.mxu0 %v3269_v2  ;;  %1274 = vmatprep.mubr.f32.mxu1 %v3269_v2 }
  0x81   :  { %1596 = vmatprep.subr.mxu0 %v3560_v13  ;;  %1744 = vmatprep.subr.mxu1 %v1743_v21 }
  0x82   :  { %1153 = vmatmul.mubr.f32.gmra.mxu0 %v3340_v25  ;;  %1278 = vmatmul.mubr.f32.gmra.mxu1 %v3352_v30 }
  0x83   :  { %1158 = vmatprep.mubr.f32.mxu0 %v3269_v2  ;;  %1283 = vmatprep.mubr.f32.mxu1 %v3269_v2 }
  0x86   :  { %1161 = vmatmul.mubr.f32.gmra.mxu0 %v3343_v26  ;;  %1287 = vmatmul.mubr.f32.gmra.mxu1 %v3358_v33 }
  0x87   :  { %1166 = vmatprep.mubr.f32.mxu0 %v3269_v2  ;;  %1292 = vmatprep.mubr.f32.mxu1 %v3269_v2 }
  0x8a   :  { %1169 = vmatmul.mubr.f32.gmra.mxu0 %v3361_v34  ;;  %1296 = vmatmul.mubr.f32.gmra.mxu1 %v3380_v44 }
  0x8b   :  { %1174 = vmatprep.mubr.f32.mxu0 %v3269_v2  ;;  %1301 = vmatprep.mubr.f32.mxu1 %v3269_v2 }
  0x8e   :  { %1177 = vmatmul.mubr.f32.gmra.mxu0 %v3383_v45  ;;  %1305 = vmatmul.mubr.f32.gmra.mxu1 %v3401_v50 }
  0x8f   :  { %1182 = vmatprep.mubr.f32.mxu0 %v3269_v2  ;;  %1310 = vmatprep.mubr.f32.mxu1 %v3269_v2 }
  0x92   :  { %1185 = vmatmul.mubr.f32.gmra.mxu0 %v3393_v47  ;;  %1314 = vmatmul.mubr.f32.gmra.mxu1 %v3415_v54 }
  0x93   :  { %1190 = vmatprep.mubr.f32.mxu0 %v3269_v2  ;;  %1319 = vmatprep.mubr.f32.mxu1 %v3269_v2 }
  0x96   :  { %1193 = vmatmul.mubr.f32.gmra.mxu0 %v3418_v55  ;;  %1323 = vmatmul.mubr.f32.gmra.mxu1 %v3432_v59 }
  0x97   :  { %1399 = vmatprep.mubr.f32.mxu0 %v3269_v2  ;;  %1515 = vmatprep.mubr.f32.mxu1 %v3269_v2 }
  0x9a   :  { %1401 = vmatmul.mubr.f32.vlgmr.msra.gmra.mxu0 %v3311_v10  ;;  %1517 = vmatmul.mubr.f32.vlgmr.msra.gmra.mxu1 %v3311_v10 }
  0x9b   :  { %1598 = vmatpush1.msra.mxu0 %v3603_v23  ;;  %1750 = vmatpush1.msra.mxu1 %v1749_v31 }
  0x9c   :  { %1406 = vmatprep.mubr.f32.mxu0 %v3269_v2  ;;  %1522 = vmatprep.mubr.f32.mxu1 %v3269_v2 }
  0x9d   :  { %1865 = vmatprep.subr.mxu0 %v3567_v14  ;;  %1989 = vmatprep.subr.mxu1 %v3560_v13 }
  0x9e   :  { %1408 = vmatmul.mubr.f32.gmra.mxu0 %v3324_v17  ;;  %1524 = vmatmul.mubr.f32.gmra.mxu1 %v3324_v17 }
  0x9f   :  { %1413 = vmatprep.mubr.f32.mxu0 %v3269_v2  ;;  %1529 = vmatprep.mubr.f32.mxu1 %v3269_v2 }
  0xa2   :  { %1415 = vmatmul.mubr.f32.gmra.mxu0 %v3326_v18  ;;  %1531 = vmatmul.mubr.f32.gmra.mxu1 %v3326_v18 }
  0xa3   :  { %1420 = vmatprep.mubr.f32.mxu0 %v3269_v2  ;;  %1536 = vmatprep.mubr.f32.mxu1 %v3269_v2 }
  0xa6   :  { %1422 = vmatmul.mubr.f32.gmra.mxu0 %v3332_v20  ;;  %1538 = vmatmul.mubr.f32.gmra.mxu1 %v3332_v20 }
  0xa7   :  { %1427 = vmatprep.mubr.f32.mxu0 %v3269_v2  ;;  %1543 = vmatprep.mubr.f32.mxu1 %v3269_v2 }
  0xaa   :  { %1429 = vmatmul.mubr.f32.gmra.mxu0 %v3363_v35  ;;  %1545 = vmatmul.mubr.f32.gmra.mxu1 %v3363_v35 }
  0xab   :  { %1434 = vmatprep.mubr.f32.mxu0 %v3269_v2  ;;  %1550 = vmatprep.mubr.f32.mxu1 %v3269_v2 }
  0xae   :  { %1436 = vmatmul.mubr.f32.gmra.mxu0 %v3372_v41  ;;  %1552 = vmatmul.mubr.f32.gmra.mxu1 %v3372_v41 }
  0xaf   :  { %1441 = vmatprep.mubr.f32.mxu0 %v3269_v2  ;;  %1557 = vmatprep.mubr.f32.mxu1 %v3269_v2 }
  0xb2   :  { %1443 = vmatmul.mubr.f32.gmra.mxu0 %v3403_v51  ;;  %1559 = vmatmul.mubr.f32.gmra.mxu1 %v3403_v51 }
  0xb3   :  { %1631 = vmatprep.mubr.f32.mxu0 %v3269_v2  ;;  %1783 = vmatprep.mubr.f32.mxu1 %v3269_v2 }
  0xb6   :  { %1637 = vmatmul.mubr.f32.vlgmr.msra.gmra.mxu0 %v3367_v39  ;;  %1785 = vmatmul.mubr.f32.vlgmr.msra.gmra.mxu1 %v3311_v10 }
  0xb7   :  { %1868 = vmatpush1.msra.mxu0 %v3610_v24  ;;  %1991 = vmatpush1.msra.mxu1 %v3603_v23 }
  0xb8   :  { %1642 = vmatprep.mubr.f32.mxu0 %v3269_v2  ;;  %1790 = vmatprep.mubr.f32.mxu1 %v3269_v2 }
  0xb9   :  { %2121 = vmatprep.subr.mxu0 %v1741_v15  ;;  %2239 = vmatprep.subr.mxu1 %v3560_v13  ;;  %v4451_v15 = vand.u32 4294901760, %v3757_v9 }
  0xba   :  { %1648 = vmatmul.mubr.f32.gmra.mxu0 %v3375_v42  ;;  %1792 = vmatmul.mubr.f32.gmra.mxu1 %v3324_v17 }
  0xbb   :  { %1653 = vmatprep.mubr.f32.mxu0 %v3269_v2  ;;  %1797 = vmatprep.mubr.f32.mxu1 %v3269_v2  ;;  %v2494_v24 = vsub.f32 %v3757_v9, %v4451_v15 }
  0xbe   :  { %1659 = vmatmul.mubr.f32.gmra.mxu0 %v3396_v48  ;;  %1799 = vmatmul.mubr.f32.gmra.mxu1 %v3326_v18 }
  0xbf   :  { %1664 = vmatprep.mubr.f32.mxu0 %v3269_v2  ;;  %1804 = vmatprep.mubr.f32.mxu1 %v3269_v2 }
  0xc2   :  { %1670 = vmatmul.mubr.f32.gmra.mxu0 %v3410_v52  ;;  %1806 = vmatmul.mubr.f32.gmra.mxu1 %v3332_v20 }
  0xc3   :  { %1675 = vmatprep.mubr.f32.mxu0 %v3269_v2  ;;  %1811 = vmatprep.mubr.f32.mxu1 %v3269_v2 }
  0xc6   :  { %1681 = vmatmul.mubr.f32.gmra.mxu0 %v3427_v57  ;;  %1813 = vmatmul.mubr.f32.gmra.mxu1 %v3363_v35 }
  0xc7   :  { %1686 = vmatprep.mubr.f32.mxu0 %v3269_v2  ;;  %1818 = vmatprep.mubr.f32.mxu1 %v3269_v2 }
  0xca   :  { %1692 = vmatmul.mubr.f32.gmra.mxu0 %v3440_v61  ;;  %1820 = vmatmul.mubr.f32.gmra.mxu1 %v3372_v41 }
  0xcb   :  { %1697 = vmatprep.mubr.f32.mxu0 %v3269_v2  ;;  %1825 = vmatprep.mubr.f32.mxu1 %v3269_v2 }
  0xce   :  { %v3688_v32 = vpop.f32.mrf.mxu0  ;;  %1703 = vmatmul.mubr.f32.gmra.mxu0 %v3451_v0  ;;  %v3691_v36 = vpop.f32.mrf.mxu1  ;;  %1827 = vmatmul.mubr.f32.gmra.mxu1 %v3403_v51 }
  0xcf   :  { %1901 = vmatprep.mubr.f32.mxu0 %v3269_v2  ;;  %2024 = vmatprep.mubr.f32.mxu1 %v3269_v2  ;;  %v269_v57 = vadd.f32 %v3691_v36, %v3688_v32 }
  0xd0   :  { %v3695_v37 = vpop.f32.mrf.mxu0  ;;  %v3698_v38 = vpop.f32.mrf.mxu1 }
  0xd2   :  { %v3700_v40 = vpop.f32.mrf.mxu0  ;;  %1904 = vmatmul.mubr.f32.vlgmr.msra.gmra.mxu0 %v3330_v19  ;;  %v3705_v43 = vpop.f32.mrf.mxu1  ;;  %2028 = vmatmul.mubr.f32.vlgmr.msra.gmra.mxu1 %v3346_v27 }
  0xd3   :  { %2125 = vmatpush1.msra.mxu0 %v1747_v28  ;;  %2241 = vmatpush1.msra.mxu1 %v3603_v23  ;;  %v276_v32 = vadd.f32 %v3705_v43, %v3700_v40 }
  0xd4   :  { %v3708_v46 = vpop.f32.mrf.mxu0  ;;  %1909 = vmatprep.mubr.f32.mxu0 %v3269_v2  ;;  %v3712_v49 = vpop.f32.mrf.mxu1  ;;  %2033 = vmatprep.mubr.f32.mxu1 %v3269_v2 }
  0xd5   :  { %3129 = vmatprep.subr.mxu0 %v3269_v2  ;;  %3152 = vmatprep.subr.mxu1 %v3269_v2 }
  0xd6   :  { %v3716_v53 = vpop.f32.mrf.mxu0  ;;  %1912 = vmatmul.mubr.f32.gmra.mxu0 %v3340_v25  ;;  %v3720_v56 = vpop.f32.mrf.mxu1  ;;  %2037 = vmatmul.mubr.f32.gmra.mxu1 %v3352_v30 }
  0xd7   :  { %1917 = vmatprep.mubr.f32.mxu0 %v3269_v2  ;;  %2042 = vmatprep.mubr.f32.mxu1 %v3269_v2 }
  0xd8   :  { %v3724_v58 = vpop.f32.mrf.mxu0  ;;  %v3727_v60 = vpop.f32.mrf.mxu1 }
  0xda   :  { %v3732_v63 = vpop.f32.mrf.mxu0  ;;  %1920 = vmatmul.mubr.f32.gmra.mxu0 %v3343_v26  ;;  %v3735_v1 = vpop.f32.mrf.mxu1  ;;  %2046 = vmatmul.mubr.f32.gmra.mxu1 %v3358_v33 }
  0xdb   :  { %1925 = vmatprep.mubr.f32.mxu0 %v3269_v2  ;;  %2051 = vmatprep.mubr.f32.mxu1 %v3269_v2 }
  0xdc   :  { %v3739_v3 = vpop.f32.mrf.mxu0  ;;  %v3744_v6 = vpop.f32.mrf.mxu1 }
  0xde   :  { %v3746_v5 = vpop.f32.mrf.mxu0  ;;  %1928 = vmatmul.mubr.f32.gmra.mxu0 %v3361_v34  ;;  %v3749_v7 = vpop.f32.mrf.mxu1  ;;  %2055 = vmatmul.mubr.f32.gmra.mxu1 %v3380_v44 }
  0xdf   :  { %1933 = vmatprep.mubr.f32.mxu0 %v3269_v2  ;;  %2060 = vmatprep.mubr.f32.mxu1 %v3269_v2 }
  0xe0   :  { %v3753_v8 = vpop.f32.mrf.mxu0  ;;  %v3759_v11 = vpop.f32.mrf.mxu1 }
  0xe2   :  { %v3761_v12 = vpop.f32.mrf.mxu0  ;;  %1936 = vmatmul.mubr.f32.gmra.mxu0 %v3383_v45  ;;  %v3764_v13 = vpop.f32.mrf.mxu1  ;;  %2064 = vmatmul.mubr.f32.gmra.mxu1 %v3401_v50 }
  0xe3   :  { %1941 = vmatprep.mubr.f32.mxu0 %v3269_v2  ;;  %2069 = vmatprep.mubr.f32.mxu1 %v3269_v2 }
  0xe4   :  { %v3768_v14 = vpop.f32.mrf.mxu0  ;;  %v3772_v16 = vpop.f32.mrf.mxu1 }
  0xe6   :  { %v3774_v21 = vpop.f32.mrf.mxu0  ;;  %1944 = vmatmul.mubr.f32.gmra.mxu0 %v3393_v47  ;;  %v3777_v22 = vpop.f32.mrf.mxu1  ;;  %2073 = vmatmul.mubr.f32.gmra.mxu1 %v3415_v54  ;;  %v2495_v54 = vand.u32 4294901760, %v2494_v24 }
  0xe7   :  { %4494 = vst [vmem:[#allocation23_spill] sm:$0xff] %v3777_v22  ;;  %1949 = vmatprep.mubr.f32.mxu0 %v3269_v2  ;;  %2078 = vmatprep.mubr.f32.mxu1 %v3269_v2 }
  0xe8   :  { %v3781_v23 = vpop.f32.mrf.mxu0  ;;  %v3787_v28 = vpop.f32.mrf.mxu1 }
  0xe9   :  { %4495 = vst [vmem:[#allocation24_spill] sm:$0xff] %v3781_v23  ;;  %4496 = vst [vmem:[#allocation25_spill] sm:$0xff] %v3787_v28 }
  0xea   :  { %v387_v29 = vpop.f32.mrf.mxu0  ;;  %1952 = vmatmul.mubr.f32.gmra.mxu0 %v3418_v55  ;;  %v3790_v31 = vpop.f32.mrf.mxu1  ;;  %2082 = vmatmul.mubr.f32.gmra.mxu1 %v3432_v59 }
  0xeb   :  { %2158 = vmatprep.mubr.f32.mxu0 %v3269_v2  ;;  %2274 = vmatprep.mubr.f32.mxu1 %v3269_v2 }
  0xec   :  { %v389_v62 = vpop.f32.mrf.mxu0  ;;  %v3795_v47 = vpop.f32.mrf.mxu1 }
  0xee   :  { %v395_v50 = vpop.f32.mrf.mxu0  ;;  %2160 = vmatmul.mubr.f32.vlgmr.msra.gmra.mxu0 %v3311_v10  ;;  %v3799_v15 = vpop.f32.mrf.mxu1  ;;  %2276 = vmatmul.mubr.f32.vlgmr.msra.gmra.mxu1 %v3311_v10 }
  0xef   :  { %3130 = vmatpush3.msra.mxu0 %v3742_v4  ;;  %3153 = vmatpush3.msra.mxu1 %v2495_v54 }
  0xf0   :  { %v397_v55 = vpop.f32.mrf.mxu0  ;;  %2165 = vmatprep.mubr.f32.mxu0 %v3269_v2  ;;  %v3803_v59 = vpop.f32.mrf.mxu1  ;;  %2281 = vmatprep.mubr.f32.mxu1 %v3269_v2 }
  0xf1   :  { %3175 = vmatprep.subr.mxu0 %v3269_v2  ;;  %3198 = vmatprep.subr.mxu1 %v3269_v2 }
  0xf2   :  { %v403_v24 = vpop.f32.mrf.mxu0  ;;  %2167 = vmatmul.mubr.f32.gmra.mxu0 %v3324_v17  ;;  %v3809_v45 = vpop.f32.mrf.mxu1  ;;  %2283 = vmatmul.mubr.f32.gmra.mxu1 %v3324_v17 }
  0xf3   :  { %2172 = vmatprep.mubr.f32.mxu0 %v3269_v2  ;;  %2288 = vmatprep.mubr.f32.mxu1 %v3269_v2 }
  0xf4   :  { %v3813_v54 = vpop.f32.mrf.mxu0  ;;  %v3816_v44 = vpop.f32.mrf.mxu1 }
  0xf6   :  { %v3818_v34 = vpop.f32.mrf.mxu0  ;;  %2174 = vmatmul.mubr.f32.gmra.mxu0 %v3326_v18  ;;  %v3821_v33 = vpop.f32.mrf.mxu1  ;;  %2290 = vmatmul.mubr.f32.gmra.mxu1 %v3326_v18 }
  0xf7   :  { %2179 = vmatprep.mubr.f32.mxu0 %v3269_v2  ;;  %2295 = vmatprep.mubr.f32.mxu1 %v3269_v2 }
  0xf8   :  { %v3825_v26 = vpop.f32.mrf.mxu0  ;;  %v3828_v30 = vpop.f32.mrf.mxu1 }
  0xfa   :  { %v3830_v25 = vpop.f32.mrf.mxu0  ;;  %2181 = vmatmul.mubr.f32.gmra.mxu0 %v3332_v20  ;;  %v3833_v27 = vpop.f32.mrf.mxu1  ;;  %2297 = vmatmul.mubr.f32.gmra.mxu1 %v3332_v20  ;;  %v271_v20 = vadd.f32 %v3698_v38, %v3695_v37  ;;  %v278_v37 = vadd.f32 %v3712_v49, %v3708_v46 }
  0xfb   :  { %2186 = vmatprep.mubr.f32.mxu0 %v3269_v2  ;;  %2302 = vmatprep.mubr.f32.mxu1 %v3269_v2 }
  0xfc   :  { %v3837_v19 = vpop.f32.mrf.mxu0  ;;  %v3840_v0 = vpop.f32.mrf.mxu1  ;;  %v390_v36 = vadd.f32 %v389_v62, %v271_v20  ;;  %v283_v20 = vadd.f32 %v3720_v56, %v3716_v53  ;;  %v398_v40 = vadd.f32 %v397_v55, %v278_v37  ;;  %v285_v55 = vadd.f32 %v3727_v60, %v3724_v58 }
  0xfd   :  { %4497 = vst [vmem:[#allocation26_spill] sm:$0xff] %v3840_v0  ;;  %v388_v0 = vadd.f32 %v387_v29, %v269_v57  ;;  %v396_v29 = vadd.f32 %v395_v50, %v276_v32 }
  0xfe   :  { %v3842_v61 = vpop.f32.mrf.mxu0  ;;  %2188 = vmatmul.mubr.f32.gmra.mxu0 %v3363_v35  ;;  %v3847_v28 = vpop.f32.mrf.mxu1  ;;  %2304 = vmatmul.mubr.f32.gmra.mxu1 %v3363_v35  ;;  %v514_v62 = vadd.f32 %v3795_v47, %v390_v36  ;;  %v404_v50 = vadd.f32 %v403_v24, %v283_v20  ;;  %v523_v32 = vadd.f32 %v3803_v59, %v398_v40 }
  0xff   :  { %2193 = vmatprep.mubr.f32.mxu0 %v3269_v2  ;;  %2309 = vmatprep.mubr.f32.mxu1 %v3269_v2  ;;  %v512_v38 = vadd.f32 %v3790_v31, %v388_v0  ;;  %v521_v49 = vadd.f32 %v3799_v15, %v396_v29  ;;  %v290_v31 = vadd.f32 %v3735_v1, %v3732_v63 }
 0x100   :  { %v3851_v23 = vpop.f32.mrf.mxu0  ;;  %v3856_v52 = vpop.f32.mrf.mxu1  ;;  %v406_v24 = vadd.f32 %v3813_v54, %v285_v55  ;;  %v292_v63 = vadd.f32 %v3744_v6, %v3739_v3  ;;  %v530_v59 = vadd.f32 %v3809_v45, %v404_v50  ;;  %v297_v45 = vadd.f32 %v3749_v7, %v3746_v5 }
 0x101   :  { %4498 = vst [vmem:[#allocation27_spill] sm:$0xff] %v3856_v52 }
 0x102   :  { %v3858_v22 = vpop.f32.mrf.mxu0  ;;  %2195 = vmatmul.mubr.f32.gmra.mxu0 %v3372_v41  ;;  %v3863_v35 = vpop.f32.mrf.mxu1  ;;  %2311 = vmatmul.mubr.f32.gmra.mxu1 %v3372_v41  ;;  %v414_v3 = vadd.f32 %v3825_v26, %v292_v63  ;;  %v299_v26 = vadd.f32 %v3759_v11, %v3753_v8  ;;  %v420_v5 = vadd.f32 %v3830_v25, %v297_v45 }
 0x103   :  { %2200 = vmatprep.mubr.f32.mxu0 %v3269_v2  ;;  %2316 = vmatprep.mubr.f32.mxu1 %v3269_v2 }
 0x104   :  { %v3869_v57 = vpop.f32.mrf.mxu0  ;;  %v3873_v52 = vpop.f32.mrf.mxu1  ;;  %v541_v8 = vadd.f32 %v3828_v30, %v414_v3  ;;  %v306_v30 = vadd.f32 %v3772_v16, %v3768_v14 }
 0x106   :  { %v643_v43 = vpop.f32.mrf.mxu0  ;;  %2202 = vmatmul.mubr.f32.gmra.mxu0 %v3403_v51  ;;  %v759_v46 = vpop.f32.mrf.mxu1  ;;  %2318 = vmatmul.mubr.f32.gmra.mxu1 %v3403_v51  ;;  %v430_v14 = vadd.f32 %v3851_v23, %v306_v30 }
 0x107   :  { %v644_v41 = vadd.f32 %v643_v43, %v512_v38  ;;  %3131 = vmatprep.mubr.msk.f32.mxu0 %vm3270_vm1, %v3269_v2  ;;  %3154 = vmatprep.mubr.msk.f32.mxu1 %vm3270_vm1, %v3269_v2 }
 0x108   :  { %v645_v0 = vpop.f32.mrf.mxu0  ;;  %v761_v56 = vpop.f32.mrf.mxu1 }
 0x109   :  { %v760_v53 = vadd.f32 %v759_v46, %v644_v41  ;;  %v646_v47 = vadd.f32 %v645_v0, %v514_v62  ;;  %v304_v62 = vadd.f32 %v3764_v13, %v3761_v12  ;;  %v422_v46 = vadd.f32 %v3837_v19, %v299_v26 }
 0x10a   :  { %v650_v36 = vpop.f32.mrf.mxu0  ;;  %3132 = vmatmul.mubr.f32.vlgmr.msra.gmra.mxu0 %v3367_v39  ;;  %v766_v41 = vpop.f32.mrf.mxu1  ;;  %3155 = vmatmul.mubr.f32.vlgmr.msra.gmra.mxu1 %v3311_v10  ;;  %v412_v39 = vadd.f32 %v3818_v34, %v290_v31  ;;  %v532_v34 = vadd.f32 %v3816_v44, %v406_v24  ;;  %v548_v19 = vadd.f32 %v3833_v27, %v420_v5  ;;  %v4504_v24 = vld [vmem:[#allocation25_spill] sm:$0xff] }
 0x10b   :  { %3028 = vst [vmem:[%s4447_s2] sm:$0xff] %v760_v53  ;;  %v762_v58 = vadd.f32 %v761_v56, %v646_v47  ;;  %v651_v60 = vadd.f32 %v650_v36, %v521_v49  ;;  %3176 = vmatpush3.msra.mxu0 %v3757_v9  ;;  %3199 = vmatpush3.msra.mxu1 %v3742_v4  ;;  %v4499_v49 = vld [vmem:[#allocation23_spill] sm:$0xff]  ;;  %v4500_v47 = vld [vmem:[#allocation16_spill] sm:$0xff]  ;;  %v4501_v56 = vld [vmem:[#allocation26_spill] sm:$0xff] }
 0x10c   :  { %v652_v1 = vpop.f32.mrf.mxu0  ;;  %3134 = vmatprep.mubr.msk.f32.mxu0 %vm3270_vm1, %v3269_v2  ;;  %v768_v37 = vpop.f32.mrf.mxu1  ;;  %3157 = vmatprep.mubr.msk.f32.mxu1 %vm3270_vm1, %v3269_v2  ;;  %v539_v44 = vadd.f32 %v3821_v33, %v412_v39  ;;  %v311_v53 = vadd.f32 %v4499_v49, %v3774_v21  ;;  %v550_v31 = vadd.f32 %v4501_v56, %v422_v46  ;;  %v4502_v36 = vld [vmem:[#allocation3_spill] sm:$0xff]  ;;  %v4503_v21 = vld [vmem:[#allocation24_spill] sm:$0xff]  ;;  %v4510_v46 = vld [vmem:[#allocation22_spill] sm:$0xff] }
 0x10d   :  { %3029 = vst [vmem:[%s4447_s2 + $0x8] sm:$0xff] %v762_v58  ;;  %v767_v15 = vadd.f32 %v766_v41, %v651_v60  ;;  %v653_v54 = vadd.f32 %v652_v1, %v523_v32  ;;  %3221 = vmatprep.subr.mxu0 %v3269_v2  ;;  %3244 = vmatprep.subr.mxu1 %v3269_v2  ;;  %v4505_v39 = vld [vmem:[#allocation27_spill] sm:$0xff] }
 0x10e   :  { %v657_v6 = vpop.f32.mrf.mxu0  ;;  %3135 = vmatmul.mubr.f32.gmra.mxu0 %v3375_v42  ;;  %v773_v20 = vpop.f32.mrf.mxu1  ;;  %3158 = vmatmul.mubr.f32.gmra.mxu1 %v3324_v17  ;;  %v313_v23 = vadd.f32 %v4504_v24, %v4503_v21  ;;  %v436_v41 = vadd.f32 %v3858_v22, %v311_v53 }
 0x10f   :  { %3035 = vst [vmem:[%s4447_s2 + $0x38] sm:$0xff] %v767_v15  ;;  %v769_v38 = vadd.f32 %v768_v37, %v653_v54  ;;  %v658_v29 = vadd.f32 %v657_v6, %v530_v59  ;;  %3137 = vmatprep.mubr.msk.f32.mxu0 %vm3270_vm1, %v3269_v2  ;;  %3160 = vmatprep.mubr.msk.f32.mxu1 %vm3270_vm1, %v3269_v2  ;;  %v4506_v37 = vld [vmem:[#allocation19_spill] sm:$0xff]  ;;  %v4507_v6 = vld [vmem:[#allocation10_spill] sm:$0xff] }
 0x110   :  { %v659_v42 = vpop.f32.mrf.mxu0  ;;  %v775_v43 = vpop.f32.mrf.mxu1  ;;  %v559_v15 = vadd.f32 %v4505_v39, %v430_v14  ;;  %v438_v45 = vadd.f32 %v3869_v57, %v313_v23  ;;  %v4518_v23 = vld [vmem:[#allocation9_spill] sm:$0xff] }
 0x111   :  { %3036 = vst [vmem:[%s4447_s2 + $0x40] sm:$0xff] %v769_v38  ;;  %v774_v7 = vadd.f32 %v773_v20, %v658_v29  ;;  %v660_v40 = vadd.f32 %v659_v42, %v532_v34  ;;  %v566_v38 = vadd.f32 %v3863_v35, %v436_v41  ;;  %v4508_v42 = vld [vmem:[#allocation21_spill] sm:$0xff]  ;;  %v4509_v35 = vld [vmem:[#allocation11_spill] sm:$0xff] }
 0x112   :  { %v664_v11 = vpop.f32.mrf.mxu0  ;;  %3138 = vmatmul.mubr.f32.gmra.mxu0 %v3396_v48  ;;  %v780_v50 = vpop.f32.mrf.mxu1  ;;  %3161 = vmatmul.mubr.f32.gmra.mxu1 %v3326_v18  ;;  %v428_v48 = vadd.f32 %v3842_v61, %v304_v62 }
 0x113   :  { %3042 = vst [vmem:[%s4447_s2 + $0x70] sm:$0xff] %v774_v7  ;;  %v776_v25 = vadd.f32 %v775_v43, %v660_v40  ;;  %v665_v33 = vadd.f32 %v664_v11, %v539_v44  ;;  %3140 = vmatprep.mubr.msk.f32.mxu0 %vm3270_vm1, %v3269_v2  ;;  %3163 = vmatprep.mubr.msk.f32.mxu1 %vm3270_vm1, %v3269_v2 }
 0x114   :  { %v666_v12 = vpop.f32.mrf.mxu0  ;;  %v782_v55 = vpop.f32.mrf.mxu1  ;;  %v557_v60 = vadd.f32 %v3847_v28, %v428_v48  ;;  %v568_v44 = vadd.f32 %v3873_v52, %v438_v45  ;;  %v4512_v48 = vand.u32 4294901760, %v3757_v9  ;;  %v4514_v9 = vld [vmem:[#allocation4_spill] sm:$0xff] }
 0x115   :  { %3043 = vst [vmem:[%s4447_s2 + $0x78] sm:$0xff] %v776_v25  ;;  %v781_v13 = vadd.f32 %v780_v50, %v665_v33  ;;  %v667_v0 = vadd.f32 %v666_v12, %v541_v8 }
 0x116   :  { %v671_v16 = vpop.f32.mrf.mxu0  ;;  %3141 = vmatmul.mubr.f32.gmra.mxu0 %v4500_v47  ;;  %v787_v32 = vpop.f32.mrf.mxu1  ;;  %3164 = vmatmul.mubr.f32.gmra.mxu1 %v4502_v36 }
 0x117   :  { %3049 = vst [vmem:[%s4447_s2 + $0xa8] sm:$0xff] %v781_v13  ;;  %v783_v27 = vadd.f32 %v782_v55, %v667_v0  ;;  %v672_v61 = vadd.f32 %v671_v16, %v548_v19  ;;  %3143 = vmatprep.mubr.msk.f32.mxu0 %vm3270_vm1, %v3269_v2  ;;  %3166 = vmatprep.mubr.msk.f32.mxu1 %vm3270_vm1, %v3269_v2  ;;  %v4511_v19 = vld [vmem:[#allocation2_spill] sm:$0xff]  ;;  %v4515_v16 = vld [vmem:[#allocation7_spill] sm:$0xff] }
 0x118   :  { %v673_v58 = vpop.f32.mrf.mxu0  ;;  %v789_v1 = vpop.f32.mrf.mxu1  ;;  %v4513_v0 = vld [vmem:[#allocation6_spill] sm:$0xff] }
 0x119   :  { %3050 = vst [vmem:[%s4447_s2 + $0xb0] sm:$0xff] %v783_v27  ;;  %v788_v63 = vadd.f32 %v787_v32, %v672_v61  ;;  %v674_v59 = vadd.f32 %v673_v58, %v550_v31  ;;  %v4516_v31 = vld [vmem:[#allocation5_spill] sm:$0xff]  ;;  %v4517_v61 = vld [vmem:[#allocation8_spill] sm:$0xff] }
 0x11a   :  { %v678_v54 = vpop.f32.mrf.mxu0  ;;  %3144 = vmatmul.mubr.f32.gmra.mxu0 %v4506_v37  ;;  %v794_v3 = vpop.f32.mrf.mxu1  ;;  %3167 = vmatmul.mubr.f32.gmra.mxu1 %v4507_v6 }
 0x11b   :  { %3056 = vst [vmem:[%s4447_s2 + $0xe0] sm:$0xff] %v788_v63  ;;  %v790_v28 = vadd.f32 %v789_v1, %v674_v59  ;;  %v679_v22 = vadd.f32 %v678_v54, %v557_v60  ;;  %3146 = vmatprep.mubr.msk.f32.mxu0 %vm3270_vm1, %v3269_v2  ;;  %3169 = vmatprep.mubr.msk.f32.mxu1 %vm3270_vm1, %v3269_v2  ;;  %v4519_v60 = vld [vmem:[#allocation12_spill] sm:$0xff]  ;;  %v4520_v1 = vld [vmem:[#allocation13_spill] sm:$0xff] }
 0x11c   :  { %v680_v34 = vpop.f32.mrf.mxu0  ;;  %v796_v20 = vpop.f32.mrf.mxu1 }
 0x11d   :  { %3057 = vst [vmem:[%s4447_s2 + $0xe8] sm:$0xff] %v790_v28  ;;  %v795_v57 = vadd.f32 %v794_v3, %v679_v22  ;;  %v681_v29 = vadd.f32 %v680_v34, %v559_v15  ;;  %v4521_v15 = vld [vmem:[#allocation15_spill] sm:$0xff]  ;;  %v4522_v28 = vld [vmem:[#allocation14_spill] sm:$0xff]  ;;  %v4523_v3 = vld [vmem:[#allocation17_spill] sm:$0xff] }
 0x11e   :  { %v685_v26 = vpop.f32.mrf.mxu0  ;;  %3147 = vmatmul.mubr.f32.gmra.mxu0 %v4508_v42  ;;  %v801_v40 = vpop.f32.mrf.mxu1  ;;  %3170 = vmatmul.mubr.f32.gmra.mxu1 %v4509_v35 }
 0x11f   :  { %3063 = vst [vmem:[%s4447_s2 + $0x118] sm:$0xff] %v795_v57  ;;  %v797_v5 = vadd.f32 %v796_v20, %v681_v29  ;;  %v686_v7 = vadd.f32 %v685_v26, %v566_v38  ;;  %3149 = vmatprep.mubr.msk.f32.mxu0 %vm3270_vm1, %v3269_v2  ;;  %3172 = vmatprep.mubr.msk.f32.mxu1 %vm3270_vm1, %v3269_v2  ;;  %v4524_v29 = vld [vmem:[#allocation18_spill] sm:$0xff]  ;;  %v4525_v26 = vld [vmem:[#allocation20_spill] sm:$0xff] }
 0x120   :  { %v687_v43 = vpop.f32.mrf.mxu0  ;;  %v803_v8 = vpop.f32.mrf.mxu1 }
 0x121   :  { %3064 = vst [vmem:[%s4447_s2 + $0x120] sm:$0xff] %v797_v5  ;;  %v802_v52 = vadd.f32 %v801_v40, %v686_v7  ;;  %v688_v62 = vadd.f32 %v687_v43, %v568_v44 }
 0x122   :  { %v3999_v11 = vpop.f32.mrf.mxu0  ;;  %3150 = vmatmul.mubr.f32.gmra.mxu0 %v4510_v46  ;;  %v4005_v33 = vpop.f32.mrf.mxu1  ;;  %3173 = vmatmul.mubr.f32.gmra.mxu1 %v3403_v51 }
 0x123   :  { %3070 = vst [vmem:[%s4447_s2 + $0x150] sm:$0xff] %v802_v52  ;;  %v804_v25 = vadd.f32 %v803_v8, %v688_v62  ;;  %3177 = vmatprep.mubr.msk.f32.mxu0 %vm3270_vm1, %v3269_v2  ;;  %3200 = vmatprep.mubr.msk.f32.mxu1 %vm3270_vm1, %v3269_v2 }
 0x124   :  { %v4010_v50 = vpop.f32.mrf.mxu0  ;;  %v4017_v30 = vpop.f32.mrf.mxu1 }
 0x125   :  { %3071 = vst [vmem:[%s4447_s2 + $0x158] sm:$0xff] %v804_v25 }
 0x126   :  { %v4019_v12 = vpop.f32.mrf.mxu0  ;;  %3178 = vmatmul.mubr.f32.vlgmr.msra.gmra.mxu0 %v4511_v19  ;;  %v4024_v13 = vpop.f32.mrf.mxu1  ;;  %3201 = vmatmul.mubr.f32.vlgmr.msra.gmra.mxu1 %v4513_v0 }
 0x127   :  { %3222 = vmatpush3.msra.mxu0 %v4512_v48  ;;  %3245 = vmatpush3.msra.mxu1 %v3742_v4 }
 0x128   :  { %v4027_v55 = vpop.f32.mrf.mxu0  ;;  %3180 = vmatprep.mubr.msk.f32.mxu0 %vm3270_vm1, %v3269_v2  ;;  %v4032_v49 = vpop.f32.mrf.mxu1  ;;  %3203 = vmatprep.mubr.msk.f32.mxu1 %vm3270_vm1, %v3269_v2 }
 0x12a   :  { %v4036_v53 = vpop.f32.mrf.mxu0  ;;  %3181 = vmatmul.mubr.f32.gmra.mxu0 %v4514_v9  ;;  %v4039_v14 = vpop.f32.mrf.mxu1  ;;  %3204 = vmatmul.mubr.f32.gmra.mxu1 %v4515_v16 }
 0x12b   :  { %3183 = vmatprep.mubr.msk.f32.mxu0 %vm3270_vm1, %v3269_v2  ;;  %3206 = vmatprep.mubr.msk.f32.mxu1 %vm3270_vm1, %v3269_v2 }
 0x12c   :  { %v4044_v4 = vpop.f32.mrf.mxu0  ;;  %v4048_v47 = vpop.f32.mrf.mxu1 }
 0x12e   :  { %v4050_v56 = vpop.f32.mrf.mxu0  ;;  %3184 = vmatmul.mubr.f32.gmra.mxu0 %v4516_v31  ;;  %v4053_v27 = vpop.f32.mrf.mxu1  ;;  %3207 = vmatmul.mubr.f32.gmra.mxu1 %v4517_v61  ;;  %v1028_v31 = vadd.f32 %v4005_v33, %v3999_v11 }
 0x12f   :  { %3186 = vmatprep.mubr.msk.f32.mxu0 %vm3270_vm1, %v3269_v2  ;;  %3209 = vmatprep.mubr.msk.f32.mxu1 %vm3270_vm1, %v3269_v2 }
 0x130   :  { %v4058_v32 = vpop.f32.mrf.mxu0  ;;  %v4062_v21 = vpop.f32.mrf.mxu1 }
 0x132   :  { %v4064_v24 = vpop.f32.mrf.mxu0  ;;  %3187 = vmatmul.mubr.f32.gmra.mxu0 %v4518_v23  ;;  %v4067_v58 = vpop.f32.mrf.mxu1  ;;  %3210 = vmatmul.mubr.f32.gmra.mxu1 %v4519_v60  ;;  %v1030_v23 = vadd.f32 %v4017_v30, %v4010_v50  ;;  %v1037_v50 = vadd.f32 %v4032_v49, %v4027_v55 }
 0x133   :  { %3189 = vmatprep.mubr.msk.f32.mxu0 %vm3270_vm1, %v3269_v2  ;;  %3212 = vmatprep.mubr.msk.f32.mxu1 %vm3270_vm1, %v3269_v2 }
 0x134   :  { %v4072_v41 = vpop.f32.mrf.mxu0  ;;  %v4076_v63 = vpop.f32.mrf.mxu1 }
 0x136   :  { %v4078_v59 = vpop.f32.mrf.mxu0  ;;  %3190 = vmatmul.mubr.f32.gmra.mxu0 %v4520_v1  ;;  %v4081_v39 = vpop.f32.mrf.mxu1  ;;  %3213 = vmatmul.mubr.f32.gmra.mxu1 %v4521_v15 }
 0x137   :  { %3192 = vmatprep.mubr.msk.f32.mxu0 %vm3270_vm1, %v3269_v2  ;;  %3215 = vmatprep.mubr.msk.f32.mxu1 %vm3270_vm1, %v3269_v2 }
 0x138   :  { %v4086_v54 = vpop.f32.mrf.mxu0  ;;  %v4090_v37 = vpop.f32.mrf.mxu1 }
 0x13a   :  { %v4092_v45 = vpop.f32.mrf.mxu0  ;;  %3193 = vmatmul.mubr.f32.gmra.mxu0 %v4522_v28  ;;  %v4095_v22 = vpop.f32.mrf.mxu1  ;;  %3216 = vmatmul.mubr.f32.gmra.mxu1 %v4523_v3 }
 0x13b   :  { %3195 = vmatprep.mubr.msk.f32.mxu0 %vm3270_vm1, %v3269_v2  ;;  %3218 = vmatprep.mubr.msk.f32.mxu1 %vm3270_vm1, %v3269_v2 }
 0x13c   :  { %v4100_v34 = vpop.f32.mrf.mxu0  ;;  %v4104_v38 = vpop.f32.mrf.mxu1 }
 0x13e   :  { %v1146_v57 = vpop.f32.mrf.mxu0  ;;  %3196 = vmatmul.mubr.f32.gmra.mxu0 %v4524_v29  ;;  %v1270_v20 = vpop.f32.mrf.mxu1  ;;  %3219 = vmatmul.mubr.f32.gmra.mxu1 %v4525_v26 }
 0x13f   :  { %3223 = vmatprep.mubr.msk.f32.mxu0 %vm3270_vm1, %v3269_v2  ;;  %3246 = vmatprep.mubr.msk.f32.mxu1 %vm3270_vm1, %v3269_v2  ;;  %v1147_v60 = vadd.f32 %v1146_v57, %v1028_v31 }
 0x140   :  { %v1148_v42 = vpop.f32.mrf.mxu0  ;;  %v1272_v44 = vpop.f32.mrf.mxu1 }
 0x141   :  { %v1149_v11 = vadd.f32 %v1148_v42, %v1030_v23  ;;  %v1271_v30 = vadd.f32 %v1270_v20, %v1147_v60  ;;  %v1049_v60 = vadd.f32 %v4053_v27, %v4050_v56 }
 0x142   :  { %v1154_v5 = vpop.f32.mrf.mxu0  ;;  %3224 = vmatmul.mubr.f32.vlgmr.msra.gmra.mxu0 %v3311_v10  ;;  %v4113_v7 = vpop.f32.mrf.mxu1  ;;  %3247 = vmatmul.mubr.f32.vlgmr.msra.gmra.mxu1 %v3311_v10 }
 0x143   :  { %3226 = vmatprep.mubr.msk.f32.mxu0 %vm3270_vm1, %v3269_v2  ;;  %3249 = vmatprep.mubr.msk.f32.mxu1 %vm3270_vm1, %v3269_v2 }
 0x144   :  { %v1156_v40 = vpop.f32.mrf.mxu0  ;;  %v4120_v43 = vpop.f32.mrf.mxu1 }
 0x145   :  { %v1157_v29 = vadd.f32 %v1156_v40, %v1037_v50 }
 0x146   :  { %v1162_v52 = vpop.f32.mrf.mxu0  ;;  %3227 = vmatmul.mubr.f32.gmra.mxu0 %v3324_v17  ;;  %v4123_v62 = vpop.f32.mrf.mxu1  ;;  %3250 = vmatmul.mubr.f32.gmra.mxu1 %v3324_v17 }
 0x147   :  { %3229 = vmatprep.mubr.msk.f32.mxu0 %vm3270_vm1, %v3269_v2  ;;  %3252 = vmatprep.mubr.msk.f32.mxu1 %vm3270_vm1, %v3269_v2 }
 0x148   :  { %v1164_v10 = vpop.f32.mrf.mxu0  ;;  %v4130_v8 = vpop.f32.mrf.mxu1 }
 0x14a   :  { %v4132_v46 = vpop.f32.mrf.mxu0  ;;  %3230 = vmatmul.mubr.f32.gmra.mxu0 %v3326_v18  ;;  %v4135_v25 = vpop.f32.mrf.mxu1  ;;  %3253 = vmatmul.mubr.f32.gmra.mxu1 %v3326_v18 }
 0x14b   :  { %3232 = vmatprep.mubr.msk.f32.mxu0 %vm3270_vm1, %v3269_v2  ;;  %3255 = vmatprep.mubr.msk.f32.mxu1 %vm3270_vm1, %v3269_v2 }
 0x14c   :  { %v4140_v17 = vpop.f32.mrf.mxu0  ;;  %v4144_v19 = vpop.f32.mrf.mxu1 }
 0x14e   :  { %v4146_v48 = vpop.f32.mrf.mxu0  ;;  %3233 = vmatmul.mubr.f32.gmra.mxu0 %v4502_v36  ;;  %v4149_v0 = vpop.f32.mrf.mxu1  ;;  %3256 = vmatmul.mubr.f32.gmra.mxu1 %v4502_v36 }
 0x14f   :  { %3235 = vmatprep.mubr.msk.f32.mxu0 %vm3270_vm1, %v3269_v2  ;;  %3258 = vmatprep.mubr.msk.f32.mxu1 %vm3270_vm1, %v3269_v2 }
 0x150   :  { %v4154_v18 = vpop.f32.mrf.mxu0  ;;  %v4158_v9 = vpop.f32.mrf.mxu1 }
 0x152   :  { %v4160_v16 = vpop.f32.mrf.mxu0  ;;  %3236 = vmatmul.mubr.f32.gmra.mxu0 %v4507_v6  ;;  %v4165_v61 = vpop.f32.mrf.mxu1  ;;  %3259 = vmatmul.mubr.f32.gmra.mxu1 %v4507_v6  ;;  %v1035_v6 = vadd.f32 %v4024_v13, %v4019_v12  ;;  %v1273_v13 = vadd.f32 %v1272_v44, %v1149_v11 }
 0x153   :  { %3238 = vmatprep.mubr.msk.f32.mxu0 %vm3270_vm1, %v3269_v2  ;;  %3261 = vmatprep.mubr.msk.f32.mxu1 %vm3270_vm1, %v3269_v2 }
 0x154   :  { %v4170_v36 = vpop.f32.mrf.mxu0  ;;  %v4176_v1 = vpop.f32.mrf.mxu1  ;;  %v1155_v3 = vadd.f32 %v1154_v5, %v1035_v6  ;;  %v1171_v6 = vadd.f32 %v4132_v46, %v1049_v60 }
 0x156   :  { %v4178_v15 = vpop.f32.mrf.mxu0  ;;  %3239 = vmatmul.mubr.f32.gmra.mxu0 %v4509_v35  ;;  %v4183_v33 = vpop.f32.mrf.mxu1  ;;  %3262 = vmatmul.mubr.f32.gmra.mxu1 %v4509_v35  ;;  %v1042_v35 = vadd.f32 %v4039_v14, %v4036_v53  ;;  %v1280_v49 = vadd.f32 %v4113_v7, %v1155_v3  ;;  %v1282_v14 = vadd.f32 %v4120_v43, %v1157_v29 }
 0x157   :  { %3241 = vmatprep.mubr.msk.f32.mxu0 %vm3270_vm1, %v3269_v2  ;;  %3264 = vmatprep.mubr.msk.f32.mxu1 %vm3270_vm1, %v3269_v2  ;;  %v1044_v2 = vadd.f32 %v4048_v47, %v4044_v4  ;;  %v1051_v7 = vadd.f32 %v4062_v21, %v4058_v32 }
 0x158   :  { %v4188_v28 = vpop.f32.mrf.mxu0  ;;  %v4194_v57 = vpop.f32.mrf.mxu1  ;;  %v1163_v20 = vadd.f32 %v1162_v52, %v1042_v35  ;;  %v1063_v35 = vadd.f32 %v4081_v39, %v4078_v59 }
 0x159   :  { %v1165_v44 = vadd.f32 %v1164_v10, %v1044_v2  ;;  %v1056_v10 = vadd.f32 %v4067_v58, %v4064_v24  ;;  %v1173_v32 = vadd.f32 %v4140_v17, %v1051_v7 }
 0x15a   :  { %v1402_v12 = vpop.f32.mrf.mxu0  ;;  %3242 = vmatmul.mubr.f32.gmra.mxu0 %v3403_v51  ;;  %v1518_v42 = vpop.f32.mrf.mxu1  ;;  %3265 = vmatmul.mubr.f32.gmra.mxu1 %v3403_v51  ;;  %v1289_v52 = vadd.f32 %v4123_v62, %v1163_v20  ;;  %v1187_v59 = vadd.f32 %v4160_v16, %v1063_v35 }
 0x15b   :  { %v1403_v26 = vadd.f32 %v1402_v12, %v1271_v30  ;;  %v1291_v50 = vadd.f32 %v4130_v8, %v1165_v44  ;;  %v1058_v30 = vadd.f32 %v4076_v63, %v4072_v41  ;;  %v1298_v12 = vadd.f32 %v4135_v25, %v1171_v6 }
 0x15c   :  { %v1404_v55 = vpop.f32.mrf.mxu0  ;;  %v1520_v23 = vpop.f32.mrf.mxu1  ;;  %v1179_v24 = vadd.f32 %v4146_v48, %v1056_v10  ;;  %v1300_v29 = vadd.f32 %v4144_v19, %v1173_v32 }
 0x15d   :  { %v1519_v5 = vadd.f32 %v1518_v42, %v1403_v26  ;;  %v1405_v31 = vadd.f32 %v1404_v55, %v1273_v13  ;;  %v1181_v41 = vadd.f32 %v4154_v18, %v1058_v30  ;;  %v1065_v26 = vadd.f32 %v4090_v37, %v4086_v54 }
 0x15e   :  { %v1409_v53 = vpop.f32.mrf.mxu0  ;;  %v1525_v47 = vpop.f32.mrf.mxu1  ;;  %v1307_v2 = vadd.f32 %v4149_v0, %v1179_v24  ;;  %v1070_v55 = vadd.f32 %v4095_v22, %v4092_v45 }
 0x15f   :  { %3030 = vst [vmem:[%s4447_s2 + $0x10] sm:$0xff] %v1519_v5  ;;  %v1521_v51 = vadd.f32 %v1520_v23, %v1405_v31  ;;  %v1410_v4 = vadd.f32 %v1409_v53, %v1280_v49  ;;  %v1309_v20 = vadd.f32 %v4158_v9, %v1181_v41  ;;  %v1189_v54 = vadd.f32 %v4170_v36, %v1065_v26 }
 0x160   :  { %v1411_v40 = vpop.f32.mrf.mxu0  ;;  %v1527_v43 = vpop.f32.mrf.mxu1  ;;  %v1072_v5 = vadd.f32 %v4104_v38, %v4100_v34  ;;  %v1316_v23 = vadd.f32 %v4165_v61, %v1187_v59  ;;  %v1195_v45 = vadd.f32 %v4178_v15, %v1070_v55 }
 0x161   :  { %3031 = vst [vmem:[%s4447_s2 + $0x18] sm:$0xff] %v1521_v51  ;;  %v1526_v56 = vadd.f32 %v1525_v47, %v1410_v4  ;;  %v1412_v27 = vadd.f32 %v1411_v40, %v1282_v14  ;;  %v1318_v53 = vadd.f32 %v4176_v1, %v1189_v54 }
 0x162   :  { %v1416_v11 = vpop.f32.mrf.mxu0  ;;  %v1532_v46 = vpop.f32.mrf.mxu1  ;;  %v1197_v14 = vadd.f32 %v4188_v28, %v1072_v5  ;;  %v1325_v44 = vadd.f32 %v4183_v33, %v1195_v45 }
 0x163   :  { %3037 = vst [vmem:[%s4447_s2 + $0x48] sm:$0xff] %v1526_v56  ;;  %v1528_v21 = vadd.f32 %v1527_v43, %v1412_v27  ;;  %v1417_v62 = vadd.f32 %v1416_v11, %v1289_v52 }
 0x164   :  { %v1418_v3 = vpop.f32.mrf.mxu0  ;;  %v1534_v17 = vpop.f32.mrf.mxu1  ;;  %v1327_v28 = vadd.f32 %v4194_v57, %v1197_v14 }
 0x165   :  { %3038 = vst [vmem:[%s4447_s2 + $0x50] sm:$0xff] %v1528_v21  ;;  %v1533_v58 = vadd.f32 %v1532_v46, %v1417_v62  ;;  %v1419_v8 = vadd.f32 %v1418_v3, %v1291_v50 }
 0x166   :  { %v1423_v13 = vpop.f32.mrf.mxu0  ;;  %v1539_v48 = vpop.f32.mrf.mxu1 }
 0x167   :  { %3044 = vst [vmem:[%s4447_s2 + $0x80] sm:$0xff] %v1533_v58  ;;  %v1535_v63 = vadd.f32 %v1534_v17, %v1419_v8  ;;  %v1424_v25 = vadd.f32 %v1423_v13, %v1298_v12 }
 0x168   :  { %v1425_v42 = vpop.f32.mrf.mxu0  ;;  %v1541_v18 = vpop.f32.mrf.mxu1 }
 0x169   :  { %3045 = vst [vmem:[%s4447_s2 + $0x88] sm:$0xff] %v1535_v63  ;;  %v1540_v39 = vadd.f32 %v1539_v48, %v1424_v25  ;;  %v1426_v19 = vadd.f32 %v1425_v42, %v1300_v29 }
 0x16a   :  { %v1430_v49 = vpop.f32.mrf.mxu0  ;;  %v1546_v16 = vpop.f32.mrf.mxu1 }
 0x16b   :  { %3051 = vst [vmem:[%s4447_s2 + $0xb8] sm:$0xff] %v1540_v39  ;;  %v1542_v37 = vadd.f32 %v1541_v18, %v1426_v19  ;;  %v1431_v0 = vadd.f32 %v1430_v49, %v1307_v2 }
 0x16c   :  { %v1432_v31 = vpop.f32.mrf.mxu0  ;;  %v1548_v36 = vpop.f32.mrf.mxu1 }
 0x16d   :  { %3052 = vst [vmem:[%s4447_s2 + $0xc0] sm:$0xff] %v1542_v37  ;;  %v1547_v22 = vadd.f32 %v1546_v16, %v1431_v0  ;;  %v1433_v9 = vadd.f32 %v1432_v31, %v1309_v20 }
 0x16e   :  { %v1437_v60 = vpop.f32.mrf.mxu0  ;;  %v1553_v61 = vpop.f32.mrf.mxu1 }
 0x16f   :  { %3058 = vst [vmem:[%s4447_s2 + $0xf0] sm:$0xff] %v1547_v22  ;;  %v1549_v34 = vadd.f32 %v1548_v36, %v1433_v9  ;;  %v1438_v38 = vadd.f32 %v1437_v60, %v1316_v23 }
 0x170   :  { %v1439_v15 = vpop.f32.mrf.mxu0  ;;  %v1555_v47 = vpop.f32.mrf.mxu1 }
 0x171   :  { %3059 = vst [vmem:[%s4447_s2 + $0xf8] sm:$0xff] %v1549_v34  ;;  %v1554_v51 = vadd.f32 %v1553_v61, %v1438_v38  ;;  %v1440_v4 = vadd.f32 %v1439_v15, %v1318_v53 }
 0x172   :  { %v1444_v1 = vpop.f32.mrf.mxu0  ;;  %v1560_v52 = vpop.f32.mrf.mxu1 }
 0x173   :  { %3065 = vst [vmem:[%s4447_s2 + $0x128] sm:$0xff] %v1554_v51  ;;  %v1556_v7 = vadd.f32 %v1555_v47, %v1440_v4  ;;  %v1445_v40 = vadd.f32 %v1444_v1, %v1325_v44 }
 0x174   :  { %v1446_v6 = vpop.f32.mrf.mxu0  ;;  %v1562_v27 = vpop.f32.mrf.mxu1 }
 0x175   :  { %3066 = vst [vmem:[%s4447_s2 + $0x130] sm:$0xff] %v1556_v7  ;;  %v1561_v33 = vadd.f32 %v1560_v52, %v1445_v40  ;;  %v1447_v56 = vadd.f32 %v1446_v6, %v1327_v28 }
 0x176   :  { %v1638_v43 = vpop.f32.mrf.mxu0  ;;  %v1786_v10 = vpop.f32.mrf.mxu1 }
 0x177   :  { %3072 = vst [vmem:[%s4447_s2 + $0x160] sm:$0xff] %v1561_v33  ;;  %v1563_v57 = vadd.f32 %v1562_v27, %v1447_v56  ;;  %v1787_v15 = vadd.f32 %v1786_v10, %v1638_v43 }
 0x178   :  { %v1640_v11 = vpop.f32.mrf.mxu0  ;;  %v1788_v50 = vpop.f32.mrf.mxu1 }
 0x179   :  { %3073 = vst [vmem:[%s4447_s2 + $0x168] sm:$0xff] %v1563_v57  ;;  %v1789_v4 = vadd.f32 %v1788_v50, %v1640_v11 }
 0x17a   :  { %v1649_v32 = vpop.f32.mrf.mxu0  ;;  %v1793_v21 = vpop.f32.mrf.mxu1 }
 0x17b   :  { %v1794_v7 = vadd.f32 %v1793_v21, %v1649_v32 }
 0x17c   :  { %v1651_v62 = vpop.f32.mrf.mxu0  ;;  %v1795_v46 = vpop.f32.mrf.mxu1 }
 0x17d   :  { %v1796_v33 = vadd.f32 %v1795_v46, %v1651_v62 }
 0x17e   :  { %v1660_v30 = vpop.f32.mrf.mxu0  ;;  %v1800_v3 = vpop.f32.mrf.mxu1 }
 0x17f   :  { %v1801_v10 = vadd.f32 %v1800_v3, %v1660_v30 }
 0x180   :  { %v1662_v12 = vpop.f32.mrf.mxu0  ;;  %v1802_v24 = vpop.f32.mrf.mxu1 }
 0x182   :  { %v4280_v58 = vpop.f32.mrf.mxu0  ;;  %v4282_v8 = vpop.f32.mrf.mxu1 }
 0x183   :  { %v1808_v62 = vadd.f32 %v4282_v8, %v4280_v58 }
 0x184   :  { %v4284_v17 = vpop.f32.mrf.mxu0  ;;  %v4286_v35 = vpop.f32.mrf.mxu1 }
 0x186   :  { %v4288_v13 = vpop.f32.mrf.mxu0  ;;  %v4290_v29 = vpop.f32.mrf.mxu1 }
 0x188   :  { %v4292_v41 = vpop.f32.mrf.mxu0  ;;  %v4294_v63 = vpop.f32.mrf.mxu1 }
 0x18a   :  { %v4296_v25 = vpop.f32.mrf.mxu0  ;;  %v4298_v48 = vpop.f32.mrf.mxu1 }
 0x18c   :  { %v4300_v26 = vpop.f32.mrf.mxu0  ;;  %v4302_v42 = vpop.f32.mrf.mxu1 }
 0x18e   :  { %v4304_v2 = vpop.f32.mrf.mxu0  ;;  %v4306_v59 = vpop.f32.mrf.mxu1 }
 0x190   :  { %v4308_v39 = vpop.f32.mrf.mxu0  ;;  %v4310_v19 = vpop.f32.mrf.mxu1 }
 0x192   :  { %v1905_v18 = vpop.f32.mrf.mxu0  ;;  %v2029_v55 = vpop.f32.mrf.mxu1 }
 0x193   :  { %v1906_v47 = vadd.f32 %v1905_v18, %v1787_v15  ;;  %v1803_v15 = vadd.f32 %v1802_v24, %v1662_v12  ;;  %v1810_v12 = vadd.f32 %v4286_v35, %v4284_v17 }
 0x194   :  { %v1907_v49 = vpop.f32.mrf.mxu0  ;;  %v2031_v20 = vpop.f32.mrf.mxu1 }
 0x195   :  { %v1908_v40 = vadd.f32 %v1907_v49, %v1789_v4  ;;  %v2030_v56 = vadd.f32 %v2029_v55, %v1906_v47 }
 0x196   :  { %v1913_v54 = vpop.f32.mrf.mxu0  ;;  %v2038_v37 = vpop.f32.mrf.mxu1 }
 0x197   :  { %v1914_v27 = vadd.f32 %v1913_v54, %v1794_v7 }
 0x198   :  { %v1915_v0 = vpop.f32.mrf.mxu0  ;;  %v2040_v16 = vpop.f32.mrf.mxu1 }
 0x199   :  { %v1916_v11 = vadd.f32 %v1915_v0, %v1796_v33 }
 0x19a   :  { %v1921_v5 = vpop.f32.mrf.mxu0  ;;  %v2047_v31 = vpop.f32.mrf.mxu1 }
 0x19b   :  { %v1922_v32 = vadd.f32 %v1921_v5, %v1801_v10  ;;  %v2041_v55 = vadd.f32 %v2040_v16, %v1916_v11  ;;  %v1815_v5 = vadd.f32 %v4290_v29, %v4288_v13  ;;  %v1829_v10 = vadd.f32 %v4306_v59, %v4304_v2 }
 0x19c   :  { %v1923_v23 = vpop.f32.mrf.mxu0  ;;  %v2049_v45 = vpop.f32.mrf.mxu1 }
 0x19d   :  { %v1924_v54 = vadd.f32 %v1923_v23, %v1803_v15 }
 0x19e   :  { %v1929_v22 = vpop.f32.mrf.mxu0  ;;  %v2056_v9 = vpop.f32.mrf.mxu1 }
 0x19f   :  { %v1930_v0 = vadd.f32 %v1929_v22, %v1808_v62  ;;  %v1817_v22 = vadd.f32 %v4294_v63, %v4292_v41 }
 0x1a0   :  { %v1931_v36 = vpop.f32.mrf.mxu0  ;;  %v4312_v60 = vpop.f32.mrf.mxu1 }
 0x1a1   :  { %v1932_v47 = vadd.f32 %v1931_v36, %v1810_v12  ;;  %v1822_v36 = vadd.f32 %v4298_v48, %v4296_v25 }
 0x1a2   :  { %v1937_v53 = vpop.f32.mrf.mxu0  ;;  %v4314_v14 = vpop.f32.mrf.mxu1 }
 0x1a3   :  { %v1938_v7 = vadd.f32 %v1937_v53, %v1815_v5  ;;  %v2059_v33 = vadd.f32 %v4312_v60, %v1932_v47  ;;  %v1824_v53 = vadd.f32 %v4302_v42, %v4300_v26 }
 0x1a4   :  { %v4316_v34 = vpop.f32.mrf.mxu0  ;;  %v4318_v38 = vpop.f32.mrf.mxu1 }
 0x1a6   :  { %v4320_v61 = vpop.f32.mrf.mxu0  ;;  %v4322_v44 = vpop.f32.mrf.mxu1 }
 0x1a7   :  { %4526 = vst [vmem:[#allocation23_spill] sm:$0xff] %v4322_v44  ;;  %v2032_v44 = vadd.f32 %v2031_v20, %v1908_v40  ;;  %v1946_v25 = vadd.f32 %v4320_v61, %v1822_v36 }
 0x1a8   :  { %v4324_v51 = vpop.f32.mrf.mxu0  ;;  %v4326_v1 = vpop.f32.mrf.mxu1 }
 0x1a9   :  { %4527 = vst [vmem:[#allocation16_spill] sm:$0xff] %v4326_v1  ;;  %v1948_v26 = vadd.f32 %v4324_v51, %v1824_v53 }
 0x1aa   :  { %v4328_v28 = vpop.f32.mrf.mxu0  ;;  %v4330_v52 = vpop.f32.mrf.mxu1 }
 0x1ab   :  { %4528 = vst [vmem:[#allocation26_spill] sm:$0xff] %v4328_v28  ;;  %v2039_v28 = vadd.f32 %v2038_v37, %v1914_v27  ;;  %v2048_v37 = vadd.f32 %v2047_v31, %v1922_v32 }
 0x1ac   :  { %v4332_v6 = vpop.f32.mrf.mxu0  ;;  %v4334_v43 = vpop.f32.mrf.mxu1 }
 0x1ae   :  { %v2161_v57 = vpop.f32.mrf.mxu0  ;;  %v2277_v18 = vpop.f32.mrf.mxu1  ;;  %v4529_v32 = vld [vmem:[#allocation23_spill] sm:$0xff] }
 0x1af   :  { %v2162_v50 = vadd.f32 %v2161_v57, %v2030_v56  ;;  %v1940_v56 = vadd.f32 %v4316_v34, %v1817_v22  ;;  %v2066_v57 = vadd.f32 %v4314_v14, %v1938_v7 }
 0x1b0   :  { %v2163_v1 = vpop.f32.mrf.mxu0  ;;  %v2279_v4 = vpop.f32.mrf.mxu1  ;;  %v4531_v62 = vld [vmem:[#allocation16_spill] sm:$0xff] }
 0x1b1   :  { %v2278_v21 = vadd.f32 %v2277_v18, %v2162_v50  ;;  %v2164_v49 = vadd.f32 %v2163_v1, %v2032_v44  ;;  %v2050_v44 = vadd.f32 %v2049_v45, %v1924_v54  ;;  %v2068_v50 = vadd.f32 %v4318_v38, %v1940_v56 }
 0x1b2   :  { %v2168_v46 = vpop.f32.mrf.mxu0  ;;  %v2284_v20 = vpop.f32.mrf.mxu1  ;;  %v1831_v18 = vadd.f32 %v4310_v19, %v4308_v39 }
 0x1b3   :  { %3032 = vst [vmem:[%s4447_s2 + $0x20] sm:$0xff] %v2278_v21  ;;  %v2280_v30 = vadd.f32 %v2279_v4, %v2164_v49  ;;  %v2169_v3 = vadd.f32 %v2168_v46, %v2039_v28  ;;  %v2057_v28 = vadd.f32 %v2056_v9, %v1930_v0  ;;  %v2075_v21 = vadd.f32 %v4529_v32, %v1946_v25  ;;  %v4530_v49 = vld [vmem:[#allocation26_spill] sm:$0xff] }
 0x1b4   :  { %v2170_v24 = vpop.f32.mrf.mxu0  ;;  %v2286_v16 = vpop.f32.mrf.mxu1  ;;  %v1954_v2 = vadd.f32 %v4530_v49, %v1829_v10  ;;  %v2077_v46 = vadd.f32 %v4531_v62, %v1948_v26 }
 0x1b5   :  { %3033 = vst [vmem:[%s4447_s2 + $0x28] sm:$0xff] %v2280_v30  ;;  %v2285_v58 = vadd.f32 %v2284_v20, %v2169_v3  ;;  %v2171_v8 = vadd.f32 %v2170_v24, %v2041_v55  ;;  %v1956_v55 = vadd.f32 %v4332_v6, %v1831_v18 }
 0x1b6   :  { %v2175_v23 = vpop.f32.mrf.mxu0  ;;  %v2291_v31 = vpop.f32.mrf.mxu1  ;;  %v2084_v3 = vadd.f32 %v4330_v52, %v1954_v2 }
 0x1b7   :  { %3039 = vst [vmem:[%s4447_s2 + $0x58] sm:$0xff] %v2285_v58  ;;  %v2287_v17 = vadd.f32 %v2286_v16, %v2171_v8  ;;  %v2176_v35 = vadd.f32 %v2175_v23, %v2048_v37  ;;  %v2086_v6 = vadd.f32 %v4334_v43, %v1956_v55 }
 0x1b8   :  { %v2177_v1 = vpop.f32.mrf.mxu0  ;;  %v2293_v45 = vpop.f32.mrf.mxu1 }
 0x1b9   :  { %3040 = vst [vmem:[%s4447_s2 + $0x60] sm:$0xff] %v2287_v17  ;;  %v2292_v13 = vadd.f32 %v2291_v31, %v2176_v35  ;;  %v2178_v29 = vadd.f32 %v2177_v1, %v2050_v44 }
 0x1ba   :  { %v2182_v40 = vpop.f32.mrf.mxu0  ;;  %v2298_v9 = vpop.f32.mrf.mxu1 }
 0x1bb   :  { %3046 = vst [vmem:[%s4447_s2 + $0x90] sm:$0xff] %v2292_v13  ;;  %v2294_v41 = vadd.f32 %v2293_v45, %v2178_v29  ;;  %v2183_v63 = vadd.f32 %v2182_v40, %v2057_v28 }
 0x1bc   :  { %v2184_v27 = vpop.f32.mrf.mxu0  ;;  %v2300_v34 = vpop.f32.mrf.mxu1 }
 0x1bd   :  { %3047 = vst [vmem:[%s4447_s2 + $0x98] sm:$0xff] %v2294_v41  ;;  %v2299_v48 = vadd.f32 %v2298_v9, %v2183_v63  ;;  %v2185_v60 = vadd.f32 %v2184_v27, %v2059_v33 }
 0x1be   :  { %v2189_v11 = vpop.f32.mrf.mxu0  ;;  %v2305_v61 = vpop.f32.mrf.mxu1 }
 0x1bf   :  { %3053 = vst [vmem:[%s4447_s2 + $0xc8] sm:$0xff] %v2299_v48  ;;  %v2301_v42 = vadd.f32 %v2300_v34, %v2185_v60  ;;  %v2190_v14 = vadd.f32 %v2189_v11, %v2066_v57 }
 0x1c0   :  { %v2191_v15 = vpop.f32.mrf.mxu0  ;;  %v2307_v51 = vpop.f32.mrf.mxu1 }
 0x1c1   :  { %3054 = vst [vmem:[%s4447_s2 + $0xd0] sm:$0xff] %v2301_v42  ;;  %v2306_v59 = vadd.f32 %v2305_v61, %v2190_v14  ;;  %v2192_v38 = vadd.f32 %v2191_v15, %v2068_v50 }
 0x1c2   :  { %v2196_v4 = vpop.f32.mrf.mxu0  ;;  %v2312_v54 = vpop.f32.mrf.mxu1 }
 0x1c3   :  { %3060 = vst [vmem:[%s4447_s2 + $0x100] sm:$0xff] %v2306_v59  ;;  %v2308_v39 = vadd.f32 %v2307_v51, %v2192_v38  ;;  %v2197_v19 = vadd.f32 %v2196_v4, %v2075_v21 }
 0x1c4   :  { %v2198_v30 = vpop.f32.mrf.mxu0  ;;  %v2314_v24 = vpop.f32.mrf.mxu1 }
 0x1c5   :  { %3061 = vst [vmem:[%s4447_s2 + $0x108] sm:$0xff] %v2308_v39  ;;  %v2313_v20 = vadd.f32 %v2312_v54, %v2197_v19  ;;  %v2199_v12 = vadd.f32 %v2198_v30, %v2077_v46 }
 0x1c6   :  { %v2203_v37 = vpop.f32.mrf.mxu0  ;;  %v2319_v8 = vpop.f32.mrf.mxu1 }
 0x1c7   :  { %3067 = vst [vmem:[%s4447_s2 + $0x138] sm:$0xff] %v2313_v20  ;;  %v2315_v0 = vadd.f32 %v2314_v24, %v2199_v12  ;;  %v2204_v58 = vadd.f32 %v2203_v37, %v2084_v3 }
 0x1c8   :  { %v2205_v16 = vpop.f32.mrf.mxu0  ;;  %v2321_v23 = vpop.f32.mrf.mxu1 }
 0x1c9   :  { %3068 = vst [vmem:[%s4447_s2 + $0x140] sm:$0xff] %v2315_v0  ;;  %v2320_v52 = vadd.f32 %v2319_v8, %v2204_v58  ;;  %v2206_v5 = vadd.f32 %v2205_v16, %v2086_v6 }
 0x1ca   :  { %v2396_v44 = vpop.f32.mrf.mxu0  ;;  %v2532_v47 = vpop.f32.mrf.mxu1 }
 0x1cb   :  { %3074 = vst [vmem:[%s4447_s2 + $0x170] sm:$0xff] %v2320_v52  ;;  %v2322_v43 = vadd.f32 %v2321_v23, %v2206_v5  ;;  %v2533_v30 = vadd.f32 %v2532_v47, %v2396_v44 }
 0x1cc   :  { %v3133_v17 = vpop.f32.mrf.mxu0  ;;  %v3156_v35 = vpop.f32.mrf.mxu1 }
 0x1cd   :  { %3075 = vst [vmem:[%s4447_s2 + $0x178] sm:$0xff] %v2322_v43 }
 0x1ce   :  { %v2406_v31 = vpop.f32.mrf.mxu0  ;;  %v2538_v22 = vpop.f32.mrf.mxu1 }
 0x1cf   :  { %v2539_v6 = vadd.f32 %v2538_v22, %v2406_v31 }
 0x1d0   :  { %v3136_v1 = vpop.f32.mrf.mxu0  ;;  %v3159_v28 = vpop.f32.mrf.mxu1 }
 0x1d2   :  { %v2416_v7 = vpop.f32.mrf.mxu0  ;;  %v2544_v13 = vpop.f32.mrf.mxu1 }
 0x1d3   :  { %v2545_v23 = vadd.f32 %v2544_v13, %v2416_v7 }
 0x1d4   :  { %v3139_v29 = vpop.f32.mrf.mxu0  ;;  %v3162_v45 = vpop.f32.mrf.mxu1 }
 0x1d6   :  { %v2426_v36 = vpop.f32.mrf.mxu0  ;;  %v2550_v40 = vpop.f32.mrf.mxu1 }
 0x1d7   :  { %v2551_v45 = vadd.f32 %v2550_v40, %v2426_v36 }
 0x1d8   :  { %v3142_v33 = vpop.f32.mrf.mxu0  ;;  %v3165_v56 = vpop.f32.mrf.mxu1 }
 0x1da   :  { %v4406_v41 = vpop.f32.mrf.mxu0  ;;  %v4408_v63 = vpop.f32.mrf.mxu1 }
 0x1dc   :  { %v3145_v9 = vpop.f32.mrf.mxu0  ;;  %v3168_v53 = vpop.f32.mrf.mxu1 }
 0x1de   :  { %v4410_v27 = vpop.f32.mrf.mxu0  ;;  %v4412_v57 = vpop.f32.mrf.mxu1 }
 0x1e0   :  { %v3148_v25 = vpop.f32.mrf.mxu0  ;;  %v3171_v48 = vpop.f32.mrf.mxu1 }
 0x1e1   :  { %v2557_v25 = vadd.f32 %v4408_v63, %v4406_v41 }
 0x1e2   :  { %v4414_v60 = vpop.f32.mrf.mxu0  ;;  %v4416_v34 = vpop.f32.mrf.mxu1 }
 0x1e4   :  { %v3151_v10 = vpop.f32.mrf.mxu0  ;;  %v3174_v11 = vpop.f32.mrf.mxu1 }
 0x1e6   :  { %v2642_v50 = vpop.f32.mrf.mxu0  ;;  %v2758_v26 = vpop.f32.mrf.mxu1 }
 0x1e7   :  { %v2643_v12 = vadd.f32 %v2642_v50, %v2533_v30 }
 0x1e8   :  { %v3179_v42 = vpop.f32.mrf.mxu0  ;;  %v3202_v14 = vpop.f32.mrf.mxu1 }
 0x1e9   :  { %v2759_v8 = vadd.f32 %v2758_v26, %v2643_v12  ;;  %v2563_v14 = vadd.f32 %v4412_v57, %v4410_v27 }
 0x1ea   :  { %v2649_v61 = vpop.f32.mrf.mxu0  ;;  %v2766_v18 = vpop.f32.mrf.mxu1 }
 0x1eb   :  { %v2650_v16 = vadd.f32 %v2649_v61, %v2539_v6 }
 0x1ec   :  { %v3182_v15 = vpop.f32.mrf.mxu0  ;;  %v3205_v32 = vpop.f32.mrf.mxu1 }
 0x1ed   :  { %v2767_v1 = vadd.f32 %v2766_v18, %v2650_v16 }
 0x1ee   :  { %v2656_v21 = vpop.f32.mrf.mxu0  ;;  %v2774_v49 = vpop.f32.mrf.mxu1 }
 0x1ef   :  { %v2657_v28 = vadd.f32 %v2656_v21, %v2545_v23 }
 0x1f0   :  { %v3185_v2 = vpop.f32.mrf.mxu0  ;;  %v3208_v59 = vpop.f32.mrf.mxu1 }
 0x1f1   :  { %v2775_v56 = vadd.f32 %v2774_v49, %v2657_v28  ;;  %v2569_v2 = vadd.f32 %v4416_v34, %v4414_v60 }
 0x1f2   :  { %v2663_v38 = vpop.f32.mrf.mxu0  ;;  %v2782_v51 = vpop.f32.mrf.mxu1 }
 0x1f3   :  { %v2664_v9 = vadd.f32 %v2663_v38, %v2551_v45 }
 0x1f4   :  { %v3188_v4 = vpop.f32.mrf.mxu0  ;;  %v3211_v62 = vpop.f32.mrf.mxu1 }
 0x1f5   :  { %v2783_v10 = vadd.f32 %v2782_v51, %v2664_v9 }
 0x1f6   :  { %v2670_v46 = vpop.f32.mrf.mxu0  ;;  %v2790_v55 = vpop.f32.mrf.mxu1 }
 0x1f7   :  { %v2671_v11 = vadd.f32 %v2670_v46, %v2557_v25 }
 0x1f8   :  { %v3191_v39 = vpop.f32.mrf.mxu0  ;;  %v3214_v19 = vpop.f32.mrf.mxu1 }
 0x1f9   :  { %v2791_v18 = vadd.f32 %v2790_v55, %v2671_v11 }
 0x1fa   :  { %v2677_v54 = vpop.f32.mrf.mxu0  ;;  %v2798_v3 = vpop.f32.mrf.mxu1 }
 0x1fb   :  { %v2678_v15 = vadd.f32 %v2677_v54, %v2563_v14 }
 0x1fc   :  { %v3194_v20 = vpop.f32.mrf.mxu0  ;;  %v3217_v24 = vpop.f32.mrf.mxu1 }
 0x1fd   :  { %v2799_v38 = vadd.f32 %v2798_v3, %v2678_v15 }
 0x1fe   :  { %v2684_v37 = vpop.f32.mrf.mxu0  ;;  %v2806_v0 = vpop.f32.mrf.mxu1 }
 0x1ff   :  { %v2685_v51 = vadd.f32 %v2684_v37, %v2569_v2 }
 0x200   :  { %v3197_v58 = vpop.f32.mrf.mxu0  ;;  %v3220_v52 = vpop.f32.mrf.mxu1 }
 0x201   :  { %v2807_v60 = vadd.f32 %v2806_v0, %v2685_v51 }
 0x202   :  { %v2880_v5 = vpop.f32.mrf.mxu0  ;;  %v2988_v17 = vpop.f32.mrf.mxu1 }
 0x203   :  { %v2881_v43 = vadd.f32 %v2880_v5, %v2759_v8 }
 0x204   :  { %v3225_v35 = vpop.f32.mrf.mxu0  ;;  %v3248_v44 = vpop.f32.mrf.mxu1 }
 0x205   :  { %v2989_v29 = vadd.f32 %v2988_v17, %v2881_v43 }
 0x206   :  { %v2886_v47 = vpop.f32.mrf.mxu0  ;;  %v2994_v22 = vpop.f32.mrf.mxu1 }
 0x207   :  { %3034 = vst [vmem:[%s4447_s2 + $0x30] sm:$0xff] %v2989_v29  ;;  %v2887_v31 = vadd.f32 %v2886_v47, %v2767_v1 }
 0x208   :  { %v3228_v33 = vpop.f32.mrf.mxu0  ;;  %v3251_v7 = vpop.f32.mrf.mxu1 }
 0x209   :  { %v2995_v53 = vadd.f32 %v2994_v22, %v2887_v31 }
 0x20a   :  { %v2892_v13 = vpop.f32.mrf.mxu0  ;;  %v3000_v40 = vpop.f32.mrf.mxu1 }
 0x20b   :  { %3041 = vst [vmem:[%s4447_s2 + $0x68] sm:$0xff] %v2995_v53  ;;  %v2893_v36 = vadd.f32 %v2892_v13, %v2775_v56 }
 0x20c   :  { %v3231_v48 = vpop.f32.mrf.mxu0  ;;  %v3254_v26 = vpop.f32.mrf.mxu1 }
 0x20d   :  { %v3001_v50 = vadd.f32 %v3000_v40, %v2893_v36 }
 0x20e   :  { %v2898_v42 = vpop.f32.mrf.mxu0  ;;  %v3006_v63 = vpop.f32.mrf.mxu1 }
 0x20f   :  { %3048 = vst [vmem:[%s4447_s2 + $0xa0] sm:$0xff] %v3001_v50  ;;  %v2899_v41 = vadd.f32 %v2898_v42, %v2783_v10 }
 0x210   :  { %v3234_v61 = vpop.f32.mrf.mxu0  ;;  %v3257_v21 = vpop.f32.mrf.mxu1 }
 0x211   :  { %v3007_v32 = vadd.f32 %v3006_v63, %v2899_v41 }
 0x212   :  { %v2904_v49 = vpop.f32.mrf.mxu0  ;;  %v3012_v57 = vpop.f32.mrf.mxu1 }
 0x213   :  { %3055 = vst [vmem:[%s4447_s2 + $0xd8] sm:$0xff] %v3007_v32  ;;  %v2905_v27 = vadd.f32 %v2904_v49, %v2791_v18 }
 0x214   :  { %v3237_v59 = vpop.f32.mrf.mxu0  ;;  %v3260_v62 = vpop.f32.mrf.mxu1 }
 0x215   :  { %v3013_v4 = vadd.f32 %v3012_v57, %v2905_v27 }
 0x216   :  { %v2910_v46 = vpop.f32.mrf.mxu0  ;;  %v3018_v39 = vpop.f32.mrf.mxu1 }
 0x217   :  { %3062 = vst [vmem:[%s4447_s2 + $0x110] sm:$0xff] %v3013_v4  ;;  %v2911_v55 = vadd.f32 %v2910_v46, %v2799_v38 }
 0x218   :  { %v3240_v19 = vpop.f32.mrf.mxu0  ;;  %v3263_v54 = vpop.f32.mrf.mxu1 }
 0x219   :  { %v3019_v34 = vadd.f32 %v3018_v39, %v2911_v55 }
 0x21a   :  { %v2916_v30 = vpop.f32.mrf.mxu0  ;;  %v3024_v20 = vpop.f32.mrf.mxu1 }
 0x21b   :  { %3069 = vst [vmem:[%s4447_s2 + $0x148] sm:$0xff] %v3019_v34  ;;  %v2917_v3 = vadd.f32 %v2916_v30, %v2807_v60 }
 0x21c   :  { %v3243_v12 = vpop.f32.mrf.mxu0  ;;  %v3266_v37 = vpop.f32.mrf.mxu1 }
 0x21d   :  { %v3025_v24 = vadd.f32 %v3024_v20, %v2917_v3 }
 0x21f   :  { %3076 = vst [vmem:[%s4447_s2 + $0x180] sm:$0xff] %v3025_v24 }

</bundles_post_ra>
